<compile_context>
chip_gen: v7x
topology: tpu7x:2x2x1
jax: 0.10.0
libtpu: 0.0.40
codegen_flags: <defaults>
</compile_context>

<pallas_src>
import functools
import math

import jax
import jax.numpy as jnp
from jax.experimental import pallas as pl
from jax.experimental.pallas import tpu as pltpu


# --------------------------------------------------------------------------
# Pallas kernel: one (Bt batch rows, Tt time frames) block per grid step.
# Grid = (B // Bt, T // Tt); T axis is the (arbitrary) accumulation axis.
# --------------------------------------------------------------------------
def _ffn_kernel(scal_ref,          # SMEM (L+1,) f32: [per-layer scales ..., bv]
                feat_ref,          # VMEM (Bt, L, Tt, D) bf16
                w1_ref, b1_ref,    # (D, 128) bf16, (1, 128) f32 (LL, BN shift folded in b1)
                w2_ref, b2_ref,    # (128, 128) bf16, (1, 128) f32 (LL2)
                wv_ref,            # (1, 128) f32 (lin_proj weight @ v, folded)
                w3_ref, b3_ref,    # (256, 128) bf16, (1, 128) f32 (LL3)
                w4_ref, b4_ref,    # (128, 128) bf16 (zero-padded), (1, 128) f32 (LL4)
                out_ref,           # (Bt, 1, 128) f32
                z_acc, m_acc, v_acc,  # VMEM scratch: (Bt,1), (Bt,128), (Bt,128) f32
                *, inv_t):
    bt, L, tt, d = feat_ref.shape
    t = pl.program_id(1)

    @pl.when(t == 0)
    def _():
        z_acc[...] = jnp.zeros_like(z_acc)
        m_acc[...] = jnp.zeros_like(m_acc)
        v_acc[...] = jnp.zeros_like(v_acc)

    # (1) LL on the raw bf16 feature stack: one (Bt*L*Tt, D) @ (D, 128) MXU dot.
    #     (BN/softmax layer combine is linear -> commuted to after the matmul.)
    y = jnp.dot(feat_ref[...].reshape(bt * L * tt, d), w1_ref[...],
                preferred_element_type=jnp.float32)
    y = y.reshape(bt, L, tt, 128)

    # (2) eval-BN scale * softmax(weight_hidd) per-layer combine in the 128-lane
    #     domain; the BN shift is folded into b1 on the host.
    h1 = scal_ref[0] * y[:, 0]
    for l in range(1, L):
        h1 = h1 + scal_ref[l] * y[:, l]
    h1 = jnp.maximum(h1 + b1_ref[...], 0.0)                      # (Bt, Tt, 128)

    # (3) LL2 + ReLU.
    h2 = jnp.dot(h1.reshape(bt * tt, 128).astype(jnp.bfloat16), w2_ref[...],
                 preferred_element_type=jnp.float32) + b2_ref[...]
    h2 = jnp.maximum(h2, 0.0).reshape(bt, tt, 128)               # (Bt, Tt, 128)

    # (4) Classic_Attention scores: tanh(lin_proj(x) . v). tanh is bounded, so
    #     softmax needs no max subtraction -> unnormalized online accumulation.
    score = jnp.sum(h2 * wv_ref[...], axis=-1, keepdims=True) + scal_ref[L]
    e = jnp.exp(jnp.tanh(score))                                 # (Bt, Tt, 1)

    z_acc[...] += jnp.sum(e, axis=1)                             # (Bt, 1)
    eh = e * h2
    m_acc[...] += jnp.sum(eh, axis=1)                            # (Bt, 128)
    v_acc[...] += jnp.sum(h2 * eh, axis=1)                       # (Bt, 128)

    # (5) Finalize on the last T tile: normalize pooled stats (reference quirks
    #     kept: mean/T, var = sum - mean^2), then LL3 -> ReLU -> LL4.
    @pl.when(t == pl.num_programs(1) - 1)
    def _():
        inv_z = pl.reciprocal(z_acc[...], approx=True)           # (Bt, 1)
        mean = m_acc[...] * inv_z * inv_t                        # (Bt, 128)
        var = v_acc[...] * inv_z - mean * mean                   # (Bt, 128)
        h3 = (jnp.dot(mean.astype(jnp.bfloat16), w3_ref[:128, :],
                      preferred_element_type=jnp.float32)
              + jnp.dot(var.astype(jnp.bfloat16), w3_ref[128:, :],
                        preferred_element_type=jnp.float32)
              + b3_ref[...])
        h3 = jnp.maximum(h3, 0.0)
        out = jnp.dot(h3.astype(jnp.bfloat16), w4_ref[...],
                      preferred_element_type=jnp.float32) + b4_ref[...]
        out_ref[...] = out.reshape(bt, 1, 128)


def ffn_forward(feat, K, *, block_b=1, block_t=None):
    """feat: (B, L, T, D) pre-extracted SSL features. Returns (B, 2) f32 logits.

    block_b: batch rows per grid step (fills the MXU / amortizes step overhead
             on single-TC v5e/v6e). block_t: time frames per grid step (keeps
             the feat block within VMEM on v7x at production T; multiple of 8).
    """
    B, L, T, D = feat.shape
    if feat.dtype != jnp.bfloat16:
        feat = feat.astype(jnp.bfloat16)    # halve HBM bytes for the dominant stream
    if block_t is None:
        block_t = T                          # pass e.g. 128 for production-size T
    assert B % block_b == 0
    assert T % block_t == 0 and (block_t % 8 == 0 or block_t == T)

    grid = (B // block_b, T // block_t)
    kernel = functools.partial(_ffn_kernel, inv_t=1.0 / T)

    out = pl.pallas_call(
        kernel,
        grid=grid,
        out_shape=jax.ShapeDtypeStruct((B, 1, 128), jnp.float32),
        in_specs=[
            pl.BlockSpec(memory_space=pltpu.MemorySpace.SMEM),                # scal (L+1,)
            pl.BlockSpec((block_b, L, block_t, D), lambda b, t: (b, 0, t, 0)),  # feat bf16
            pl.BlockSpec((D, 128), lambda b, t: (0, 0)),                      # w1 (bf16)
            pl.BlockSpec((1, 128), lambda b, t: (0, 0)),                      # b1
            pl.BlockSpec((128, 128), lambda b, t: (0, 0)),                    # w2 (bf16)
            pl.BlockSpec((1, 128), lambda b, t: (0, 0)),                      # b2
            pl.BlockSpec((1, 128), lambda b, t: (0, 0)),                      # wv
            pl.BlockSpec((256, 128), lambda b, t: (0, 0)),                    # w3 (bf16)
            pl.BlockSpec((1, 128), lambda b, t: (0, 0)),                      # b3
            pl.BlockSpec((128, 128), lambda b, t: (0, 0)),                    # w4 padded (bf16)
            pl.BlockSpec((1, 128), lambda b, t: (0, 0)),                      # b4 padded
        ],
        out_specs=pl.BlockSpec((block_b, 1, 128), lambda b, t: (b, 0, 0)),
        scratch_shapes=[
            pltpu.VMEM((block_b, 1), jnp.float32),      # sum of exp(tanh(score))
            pltpu.VMEM((block_b, 128), jnp.float32),    # sum of e * x
            pltpu.VMEM((block_b, 128), jnp.float32),    # sum of e * x^2
        ],
        compiler_params=pltpu.CompilerParams(
            dimension_semantics=("parallel", "arbitrary"),
            vmem_limit_bytes=48 * 1024 * 1024),
    )(K['scal'], feat, K['w1'], K['b1'], K['w2'], K['b2'],
      K['wv'], K['w3'], K['b3'], K['w4'], K['b4'])
    return out[:, 0, :2]


# --------------------------------------------------------------------------
# Parameter construction / folding (host side, cheap, done once).
# --------------------------------------------------------------------------
def make_params(key, L, D):
    ks = iter(jax.random.split(key, 16))

    def lin(din, dout):
        bound = 1.0 / math.sqrt(din)
        w = jax.random.uniform(next(ks), (din, dout), jnp.float32, -bound, bound)
        b = jax.random.uniform(next(ks), (dout,), jnp.float32, -bound, bound)
        return w, b

    w1, b1 = lin(D, 128)       # LL
    w2, b2 = lin(128, 128)     # LL2
    wp, bp = lin(128, 128)     # Classic_Attention.lin_proj
    v = jax.random.normal(next(ks), (128,), jnp.float32)   # Classic_Attention.v
    w3, b3 = lin(256, 128)     # LL3
    w4, b4 = lin(128, 2)       # LL4
    return dict(
        weight_hidd=jnp.ones((L,), jnp.float32),
        ln_gamma=jax.random.uniform(next(ks), (L,), jnp.float32, 0.8, 1.2),
        ln_beta=0.1 * jax.random.normal(next(ks), (L,), jnp.float32),
        ln_mean=0.1 * jax.random.normal(next(ks), (L,), jnp.float32),
        ln_var=jax.random.uniform(next(ks), (L,), jnp.float32, 0.5, 1.5),
        w1=w1, b1=b1, w2=w2, b2=b2, wp=wp, bp=bp, v=v,
        w3=w3, b3=b3, w4=w4, b4=b4,
    )


def fold_params(R):
    """Fold eval-BN + softmax(weight_hidd) + attention v into kernel operands."""
    nw = jax.nn.softmax(R['weight_hidd'])
    invg = R['ln_gamma'] / jnp.sqrt(R['ln_var'] + 1e-5)
    scale = nw * invg                                       # per-layer multiplier
    shift = nw * (R['ln_beta'] - R['ln_mean'] * invg)       # per-layer scalar shift
    b1_eff = R['b1'] + jnp.sum(shift) * jnp.sum(R['w1'], axis=0)
    wv = R['wp'] @ R['v']                                   # (128,) lin_proj . v
    bv = jnp.dot(R['bp'], R['v'])                           # scalar score bias
    w4_pad = jnp.zeros((128, 128), jnp.float32).at[:, :2].set(R['w4'])
    b4_pad = jnp.zeros((128,), jnp.float32).at[:2].set(R['b4'])
    return dict(
        scal=jnp.concatenate([scale, bv[None]]).astype(jnp.float32),
        w1=R['w1'].astype(jnp.bfloat16), b1=b1_eff.reshape(1, 128),
        w2=R['w2'].astype(jnp.bfloat16), b2=R['b2'].reshape(1, 128),
        wv=wv.reshape(1, 128).astype(jnp.float32),
        w3=R['w3'].astype(jnp.bfloat16), b3=R['b3'].reshape(1, 128),
        w4=w4_pad.astype(jnp.bfloat16), b4=b4_pad.reshape(1, 128),
    )


# --------------------------------------------------------------------------
# Pure-JAX reference (direct translation of the PyTorch forward, f32).
# --------------------------------------------------------------------------
def ffn_reference(feat, R):
    invg = R['ln_gamma'] / jnp.sqrt(R['ln_var'] + 1e-5)
    f = ((feat - R['ln_mean'][None, :, None, None]) * invg[None, :, None, None]
         + R['ln_beta'][None, :, None, None])
    nw = jax.nn.softmax(R['weight_hidd'])
    wf = jnp.sum(f * nw[None, :, None, None], axis=1)          # (B, T, D)
    x = jax.nn.relu(wf @ R['w1'] + R['b1'])
    x = jax.nn.relu(x @ R['w2'] + R['b2'])
    lin = x @ R['wp'] + R['bp']
    aw = jax.nn.softmax(jnp.tanh(jnp.einsum('btd,d->bt', lin, R['v'])), axis=1)
    el = x * aw[..., None]
    mean = jnp.mean(el, axis=1)
    var = jnp.sum(x * el, axis=1) - mean * mean
    pooled = jnp.concatenate([mean, var], axis=1)
    h = jax.nn.relu(pooled @ R['w3'] + R['b3'])
    return h @ R['w4'] + R['b4']


if __name__ == "__main__":
    B, L, T, D = 2, 4, 32, 768      # small=True -> out_dim = 768
    key = jax.random.PRNGKey(0)
    kp, kf = jax.random.split(key)
    R = make_params(kp, L, D)
    feat = jax.random.normal(kf, (B, L, T, D), dtype=jnp.float32)

    K = fold_params(R)
    # block_t=16 exercises the online T-tiled accumulation path (2 T-steps);
    # block_b=1 keeps two batch grid steps so both v7x TensorCores get work.
    fwd = jax.jit(functools.partial(ffn_forward, block_b=1, block_t=16))
    out = jax.block_until_ready(fwd(feat, K))
    ref = jax.block_until_ready(ffn_reference(feat, R))

    assert out.shape == (B, 2) and out.dtype == jnp.float32
    assert bool(jnp.all(jnp.isfinite(out)))
    # bf16 feature stream + bf16 MXU operands vs f32 reference -> loose tolerance
    assert bool(jnp.allclose(out, ref, rtol=5e-2, atol=5e-2)), (out, ref)
    print("KERNEL_OK")
</pallas_src>

<mosaic_0001>
module attributes {stable_mosaic.version = 11 : i64} {
  func.func @_ffn_kernel(%arg0: i32, %arg1: i32, %arg2: memref<5xf32, #tpu.memory_space<smem>>, %arg3: memref<1x4x16x768xbf16, #tpu.memory_space<vmem>>, %arg4: memref<768x128xbf16, #tpu.memory_space<vmem>>, %arg5: memref<1x128xf32, #tpu.memory_space<vmem>>, %arg6: memref<128x128xbf16, #tpu.memory_space<vmem>>, %arg7: memref<1x128xf32, #tpu.memory_space<vmem>>, %arg8: memref<1x128xf32, #tpu.memory_space<vmem>>, %arg9: memref<256x128xbf16, #tpu.memory_space<vmem>>, %arg10: memref<1x128xf32, #tpu.memory_space<vmem>>, %arg11: memref<128x128xbf16, #tpu.memory_space<vmem>>, %arg12: memref<1x128xf32, #tpu.memory_space<vmem>>, %arg13: memref<1x1x128xf32, #tpu.memory_space<vmem>>, %arg14: memref<1x1xf32, #tpu.memory_space<vmem>>, %arg15: memref<1x128xf32, #tpu.memory_space<vmem>>, %arg16: memref<1x128xf32, #tpu.memory_space<vmem>>) attributes {dimension_semantics = [#tpu.dimension_semantics<parallel>, #tpu.dimension_semantics<arbitrary>], iteration_bounds = array<i64: 2, 2>, scalar_prefetch = 0 : i64, scratch_operands = 3 : i64, tpu.core_type = #tpu.core_type<tc>, window_params = [{transform_indices = @transform_0, window_bounds = array<i64: 5>}, {transform_indices = @transform_1, window_bounds = array<i64: 1, 4, 16, 768>}, {pipeline_mode = #tpu.pipeline_mode<synchronous>, transform_indices = @transform_2, window_bounds = array<i64: 768, 128>}, {pipeline_mode = #tpu.pipeline_mode<synchronous>, transform_indices = @transform_3, window_bounds = array<i64: 1, 128>}, {pipeline_mode = #tpu.pipeline_mode<synchronous>, transform_indices = @transform_4, window_bounds = array<i64: 128, 128>}, {pipeline_mode = #tpu.pipeline_mode<synchronous>, transform_indices = @transform_5, window_bounds = array<i64: 1, 128>}, {pipeline_mode = #tpu.pipeline_mode<synchronous>, transform_indices = @transform_6, window_bounds = array<i64: 1, 128>}, {pipeline_mode = #tpu.pipeline_mode<synchronous>, transform_indices = @transform_7, window_bounds = array<i64: 256, 128>}, {pipeline_mode = #tpu.pipeline_mode<synchronous>, transform_indices = @transform_8, window_bounds = array<i64: 1, 128>}, {pipeline_mode = #tpu.pipeline_mode<synchronous>, transform_indices = @transform_9, window_bounds = array<i64: 128, 128>}, {pipeline_mode = #tpu.pipeline_mode<synchronous>, transform_indices = @transform_10, window_bounds = array<i64: 1, 128>}, {transform_indices = @transform_11, window_bounds = array<i64: 1, 1, 128>}]} {
    %c0_i32 = arith.constant 0 : i32
    %0 = arith.cmpi eq, %arg1, %c0_i32 : i32
    %1 = arith.extui %0 : i1 to i32
    %c0_i32_0 = arith.constant 0 : i32
    %2 = arith.cmpi ne, %1, %c0_i32_0 : i32
    scf.if %2 {
      %cst_35 = arith.constant 0.000000e+00 : f32
      %76 = vector.broadcast %cst_35 : f32 to vector<1x1xf32>
      %c0_36 = arith.constant 0 : index
      %c0_37 = arith.constant 0 : index
      %77 = vector.load %arg14[%c0_36, %c0_37] : memref<1x1xf32, #tpu.memory_space<vmem>>, vector<1x1xf32>
      tpu.vector_store %arg14[%c0_36, %c0_37], %76 {strides = array<i32>} : memref<1x1xf32, #tpu.memory_space<vmem>>, vector<1x1xf32>,
      %cst_38 = arith.constant 0.000000e+00 : f32
      %78 = vector.broadcast %cst_38 : f32 to vector<1x128xf32>
      %c0_39 = arith.constant 0 : index
      %c0_40 = arith.constant 0 : index
      %79 = vector.load %arg15[%c0_39, %c0_40] : memref<1x128xf32, #tpu.memory_space<vmem>>, vector<1x128xf32>
      tpu.vector_store %arg15[%c0_39, %c0_40], %78 {strides = array<i32>} : memref<1x128xf32, #tpu.memory_space<vmem>>, vector<1x128xf32>,
      %cst_41 = arith.constant 0.000000e+00 : f32
      %80 = vector.broadcast %cst_41 : f32 to vector<1x128xf32>
      %c0_42 = arith.constant 0 : index
      %c0_43 = arith.constant 0 : index
      %81 = vector.load %arg16[%c0_42, %c0_43] : memref<1x128xf32, #tpu.memory_space<vmem>>, vector<1x128xf32>
      tpu.vector_store %arg16[%c0_42, %c0_43], %80 {strides = array<i32>} : memref<1x128xf32, #tpu.memory_space<vmem>>, vector<1x128xf32>,
    } else {
    }
    %c0 = arith.constant 0 : index
    %c0_1 = arith.constant 0 : index
    %c0_2 = arith.constant 0 : index
    %c0_3 = arith.constant 0 : index
    %3 = vector.load %arg3[%c0, %c0_1, %c0_2, %c0_3] : memref<1x4x16x768xbf16, #tpu.memory_space<vmem>>, vector<1x4x16x768xbf16>
    %4 = vector.shape_cast %3 : vector<1x4x16x768xbf16> to vector<64x768xbf16>
    %c0_4 = arith.constant 0 : index
    %c0_5 = arith.constant 0 : index
    %5 = vector.load %arg4[%c0_4, %c0_5] : memref<768x128xbf16, #tpu.memory_space<vmem>>, vector<768x128xbf16>
    %cst = arith.constant dense<0.000000e+00> : vector<64x128xf32>
    %6 = tpu.matmul %4, %5, %cst {dimension_numbers = #tpu.dot_dimension_numbers<[1], [0], [0], [1], [0, 0, 1, 1], [], []>} : vector<64x768xbf16>, vector<768x128xbf16>, vector<64x128xf32> -> vector<64x128xf32>
    %7 = vector.shape_cast %6 : vector<64x128xf32> to vector<1x4x16x128xf32>
    %c0_6 = arith.constant 0 : index
    %8 = memref.load %arg2[%c0_6] : memref<5xf32, #tpu.memory_space<smem>>
    %9 = vector.extract_strided_slice %7 {offsets = [0, 0, 0, 0], sizes = [1, 1, 16, 128], strides = [1, 1, 1, 1]} : vector<1x4x16x128xf32> to vector<1x1x16x128xf32>
    %10 = vector.shape_cast %9 : vector<1x1x16x128xf32> to vector<1x16x128xf32>
    %11 = vector.broadcast %8 : f32 to vector<1x16x128xf32>
    %12 = arith.mulf %11, %10 : vector<1x16x128xf32>
    %c1 = arith.constant 1 : index
    %13 = memref.load %arg2[%c1] : memref<5xf32, #tpu.memory_space<smem>>
    %14 = vector.extract_strided_slice %7 {offsets = [0, 1, 0, 0], sizes = [1, 1, 16, 128], strides = [1, 1, 1, 1]} : vector<1x4x16x128xf32> to vector<1x1x16x128xf32>
    %15 = vector.shape_cast %14 : vector<1x1x16x128xf32> to vector<1x16x128xf32>
    %16 = vector.broadcast %13 : f32 to vector<1x16x128xf32>
    %17 = arith.mulf %16, %15 : vector<1x16x128xf32>
    %18 = arith.addf %12, %17 : vector<1x16x128xf32>
    %c2 = arith.constant 2 : index
    %19 = memref.load %arg2[%c2] : memref<5xf32, #tpu.memory_space<smem>>
    %20 = vector.extract_strided_slice %7 {offsets = [0, 2, 0, 0], sizes = [1, 1, 16, 128], strides = [1, 1, 1, 1]} : vector<1x4x16x128xf32> to vector<1x1x16x128xf32>
    %21 = vector.shape_cast %20 : vector<1x1x16x128xf32> to vector<1x16x128xf32>
    %22 = vector.broadcast %19 : f32 to vector<1x16x128xf32>
    %23 = arith.mulf %22, %21 : vector<1x16x128xf32>
    %24 = arith.addf %18, %23 : vector<1x16x128xf32>
    %c3 = arith.constant 3 : index
    %25 = memref.load %arg2[%c3] : memref<5xf32, #tpu.memory_space<smem>>
    %26 = vector.extract_strided_slice %7 {offsets = [0, 3, 0, 0], sizes = [1, 1, 16, 128], strides = [1, 1, 1, 1]} : vector<1x4x16x128xf32> to vector<1x1x16x128xf32>
    %27 = vector.shape_cast %26 : vector<1x1x16x128xf32> to vector<1x16x128xf32>
    %28 = vector.broadcast %25 : f32 to vector<1x16x128xf32>
    %29 = arith.mulf %28, %27 : vector<1x16x128xf32>
    %30 = arith.addf %24, %29 : vector<1x16x128xf32>
    %c0_7 = arith.constant 0 : index
    %c0_8 = arith.constant 0 : index
    %31 = vector.load %arg5[%c0_7, %c0_8] : memref<1x128xf32, #tpu.memory_space<vmem>>, vector<1x128xf32>
    %32 = vector.shape_cast %31 : vector<1x128xf32> to vector<1x1x128xf32>
    %33 = vector.broadcast %32 : vector<1x1x128xf32> to vector<1x16x128xf32>
    %34 = arith.addf %30, %33 : vector<1x16x128xf32>
    %cst_9 = arith.constant 0.000000e+00 : f32
    %35 = vector.broadcast %cst_9 : f32 to vector<1x16x128xf32>
    %36 = arith.maximumf %34, %35 : vector<1x16x128xf32>
    %37 = vector.shape_cast %36 : vector<1x16x128xf32> to vector<16x128xf32>
    %38 = arith.truncf %37 : vector<16x128xf32> to vector<16x128xbf16>
    %c0_10 = arith.constant 0 : index
    %c0_11 = arith.constant 0 : index
    %39 = vector.load %arg6[%c0_10, %c0_11] : memref<128x128xbf16, #tpu.memory_space<vmem>>, vector<128x128xbf16>
    %cst_12 = arith.constant dense<0.000000e+00> : vector<16x128xf32>
    %40 = tpu.matmul %38, %39, %cst_12 {dimension_numbers = #tpu.dot_dimension_numbers<[1], [0], [0], [1], [0, 0, 1, 1], [], []>} : vector<16x128xbf16>, vector<128x128xbf16>, vector<16x128xf32> -> vector<16x128xf32>
    %c0_13 = arith.constant 0 : index
    %c0_14 = arith.constant 0 : index
    %41 = vector.load %arg7[%c0_13, %c0_14] : memref<1x128xf32, #tpu.memory_space<vmem>>, vector<1x128xf32>
    %42 = vector.broadcast %41 : vector<1x128xf32> to vector<16x128xf32>
    %43 = arith.addf %40, %42 : vector<16x128xf32>
    %cst_15 = arith.constant 0.000000e+00 : f32
    %44 = vector.broadcast %cst_15 : f32 to vector<16x128xf32>
    %45 = arith.maximumf %43, %44 : vector<16x128xf32>
    %46 = vector.shape_cast %45 : vector<16x128xf32> to vector<1x16x128xf32>
    %c0_16 = arith.constant 0 : index
    %c0_17 = arith.constant 0 : index
    %47 = vector.load %arg8[%c0_16, %c0_17] : memref<1x128xf32, #tpu.memory_space<vmem>>, vector<1x128xf32>
    %48 = vector.shape_cast %47 : vector<1x128xf32> to vector<1x1x128xf32>
    %49 = vector.broadcast %48 : vector<1x1x128xf32> to vector<1x16x128xf32>
    %50 = arith.mulf %46, %49 : vector<1x16x128xf32>
    %cst_18 = arith.constant dense<0.000000e+00> : vector<1x16xf32>
    %51 = vector.multi_reduction <add>, %50, %cst_18 [2] : vector<1x16x128xf32> to vector<1x16xf32>
    %52 = vector.shape_cast %51 : vector<1x16xf32> to vector<1x16x1xf32>
    %c4 = arith.constant 4 : index
    %53 = memref.load %arg2[%c4] : memref<5xf32, #tpu.memory_space<smem>>
    %54 = vector.broadcast %53 : f32 to vector<1x16x1xf32>
    %55 = arith.addf %52, %54 : vector<1x16x1xf32>
    %56 = math.tanh %55 : vector<1x16x1xf32>
    %57 = math.exp %56 : vector<1x16x1xf32>
    %c0_19 = arith.constant 0 : index
    %c0_20 = arith.constant 0 : index
    %58 = vector.load %arg14[%c0_19, %c0_20] : memref<1x1xf32, #tpu.memory_space<vmem>>, vector<1x1xf32>
    %cst_21 = arith.constant dense<0.000000e+00> : vector<1x1xf32>
    %59 = vector.multi_reduction <add>, %57, %cst_21 [1] : vector<1x16x1xf32> to vector<1x1xf32>
    %60 = arith.addf %58, %59 : vector<1x1xf32>
    %c0_22 = arith.constant 0 : index
    %c0_23 = arith.constant 0 : index
    %61 = vector.load %arg14[%c0_22, %c0_23] : memref<1x1xf32, #tpu.memory_space<vmem>>, vector<1x1xf32>
    tpu.vector_store %arg14[%c0_22, %c0_23], %60 {strides = array<i32>} : memref<1x1xf32, #tpu.memory_space<vmem>>, vector<1x1xf32>,
    %62 = vector.broadcast %57 : vector<1x16x1xf32> to vector<1x16x128xf32>
    %63 = arith.mulf %62, %46 : vector<1x16x128xf32>
    %c0_24 = arith.constant 0 : index
    %c0_25 = arith.constant 0 : index
    %64 = vector.load %arg15[%c0_24, %c0_25] : memref<1x128xf32, #tpu.memory_space<vmem>>, vector<1x128xf32>
    %cst_26 = arith.constant dense<0.000000e+00> : vector<1x128xf32>
    %65 = vector.multi_reduction <add>, %63, %cst_26 [1] : vector<1x16x128xf32> to vector<1x128xf32>
    %66 = arith.addf %64, %65 : vector<1x128xf32>
    %c0_27 = arith.constant 0 : index
    %c0_28 = arith.constant 0 : index
    %67 = vector.load %arg15[%c0_27, %c0_28] : memref<1x128xf32, #tpu.memory_space<vmem>>, vector<1x128xf32>
    tpu.vector_store %arg15[%c0_27, %c0_28], %66 {strides = array<i32>} : memref<1x128xf32, #tpu.memory_space<vmem>>, vector<1x128xf32>,
    %c0_29 = arith.constant 0 : index
    %c0_30 = arith.constant 0 : index
    %68 = vector.load %arg16[%c0_29, %c0_30] : memref<1x128xf32, #tpu.memory_space<vmem>>, vector<1x128xf32>
    %69 = arith.mulf %46, %63 : vector<1x16x128xf32>
    %cst_31 = arith.constant dense<0.000000e+00> : vector<1x128xf32>
    %70 = vector.multi_reduction <add>, %69, %cst_31 [1] : vector<1x16x128xf32> to vector<1x128xf32>
    %71 = arith.addf %68, %70 : vector<1x128xf32>
    %c0_32 = arith.constant 0 : index
    %c0_33 = arith.constant 0 : index
    %72 = vector.load %arg16[%c0_32, %c0_33] : memref<1x128xf32, #tpu.memory_space<vmem>>, vector<1x128xf32>
    tpu.vector_store %arg16[%c0_32, %c0_33], %71 {strides = array<i32>} : memref<1x128xf32, #tpu.memory_space<vmem>>, vector<1x128xf32>,
    %c1_i32 = arith.constant 1 : i32
    %73 = arith.cmpi eq, %arg1, %c1_i32 : i32
    %74 = arith.extui %73 : i1 to i32
    %c0_i32_34 = arith.constant 0 : i32
    %75 = arith.cmpi ne, %74, %c0_i32_34 : i32
    scf.if %75 {
      %c0_35 = arith.constant 0 : index
      %c0_36 = arith.constant 0 : index
      %76 = vector.load %arg14[%c0_35, %c0_36] : memref<1x1xf32, #tpu.memory_space<vmem>>, vector<1x1xf32>
      %77 = tpu.reciprocal %76 {approx = true} : vector<1x1xf32> -> vector<1x1xf32>
      %c0_37 = arith.constant 0 : index
      %c0_38 = arith.constant 0 : index
      %78 = vector.load %arg15[%c0_37, %c0_38] : memref<1x128xf32, #tpu.memory_space<vmem>>, vector<1x128xf32>
      %79 = vector.broadcast %77 : vector<1x1xf32> to vector<1x128xf32>
      %80 = arith.mulf %78, %79 : vector<1x128xf32>
      %cst_39 = arith.constant 3.125000e-02 : f32
      %81 = vector.broadcast %cst_39 : f32 to vector<1x128xf32>
      %82 = arith.mulf %80, %81 : vector<1x128xf32>
      %c0_40 = arith.constant 0 : index
      %c0_41 = arith.constant 0 : index
      %83 = vector.load %arg16[%c0_40, %c0_41] : memref<1x128xf32, #tpu.memory_space<vmem>>, vector<1x128xf32>
      %84 = vector.broadcast %77 : vector<1x1xf32> to vector<1x128xf32>
      %85 = arith.mulf %83, %84 : vector<1x128xf32>
      %86 = arith.mulf %82, %82 : vector<1x128xf32>
      %87 = arith.subf %85, %86 : vector<1x128xf32>
      %88 = arith.truncf %82 : vector<1x128xf32> to vector<1x128xbf16>
      %c0_42 = arith.constant 0 : index
      %c0_43 = arith.constant 0 : index
      %89 = vector.load %arg9[%c0_42, %c0_43] : memref<256x128xbf16, #tpu.memory_space<vmem>>, vector<128x128xbf16>
      %cst_44 = arith.constant dense<0.000000e+00> : vector<1x128xf32>
      %90 = tpu.matmul %88, %89, %cst_44 {dimension_numbers = #tpu.dot_dimension_numbers<[1], [0], [0], [1], [0, 0, 1, 1], [], []>} : vector<1x128xbf16>, vector<128x128xbf16>, vector<1x128xf32> -> vector<1x128xf32>
      %91 = arith.truncf %87 : vector<1x128xf32> to vector<1x128xbf16>
      %c128 = arith.constant 128 : index
      %c0_45 = arith.constant 0 : index
      %92 = vector.load %arg9[%c128, %c0_45] : memref<256x128xbf16, #tpu.memory_space<vmem>>, vector<128x128xbf16>
      %cst_46 = arith.constant dense<0.000000e+00> : vector<1x128xf32>
      %93 = tpu.matmul %91, %92, %cst_46 {dimension_numbers = #tpu.dot_dimension_numbers<[1], [0], [0], [1], [0, 0, 1, 1], [], []>} : vector<1x128xbf16>, vector<128x128xbf16>, vector<1x128xf32> -> vector<1x128xf32>
      %94 = arith.addf %90, %93 : vector<1x128xf32>
      %c0_47 = arith.constant 0 : index
      %c0_48 = arith.constant 0 : index
      %95 = vector.load %arg10[%c0_47, %c0_48] : memref<1x128xf32, #tpu.memory_space<vmem>>, vector<1x128xf32>
      %96 = arith.addf %94, %95 : vector<1x128xf32>
      %cst_49 = arith.constant 0.000000e+00 : f32
      %97 = vector.broadcast %cst_49 : f32 to vector<1x128xf32>
      %98 = arith.maximumf %96, %97 : vector<1x128xf32>
      %99 = arith.truncf %98 : vector<1x128xf32> to vector<1x128xbf16>
      %c0_50 = arith.constant 0 : index
      %c0_51 = arith.constant 0 : index
      %100 = vector.load %arg11[%c0_50, %c0_51] : memref<128x128xbf16, #tpu.memory_space<vmem>>, vector<128x128xbf16>
      %cst_52 = arith.constant dense<0.000000e+00> : vector<1x128xf32>
      %101 = tpu.matmul %99, %100, %cst_52 {dimension_numbers = #tpu.dot_dimension_numbers<[1], [0], [0], [1], [0, 0, 1, 1], [], []>} : vector<1x128xbf16>, vector<128x128xbf16>, vector<1x128xf32> -> vector<1x128xf32>
      %c0_53 = arith.constant 0 : index
      %c0_54 = arith.constant 0 : index
      %102 = vector.load %arg12[%c0_53, %c0_54] : memref<1x128xf32, #tpu.memory_space<vmem>>, vector<1x128xf32>
      %103 = arith.addf %101, %102 : vector<1x128xf32>
      %104 = vector.shape_cast %103 : vector<1x128xf32> to vector<1x1x128xf32>
      %c0_55 = arith.constant 0 : index
      %c0_56 = arith.constant 0 : index
      %c0_57 = arith.constant 0 : index
      %105 = vector.load %arg13[%c0_55, %c0_56, %c0_57] : memref<1x1x128xf32, #tpu.memory_space<vmem>>, vector<1x1x128xf32>
      tpu.vector_store %arg13[%c0_55, %c0_56, %c0_57], %104 {strides = array<i32>} : memref<1x1x128xf32, #tpu.memory_space<vmem>>, vector<1x1x128xf32>,
    } else {
    }
    return
  }
  func.func @transform_0(%arg0: i32, %arg1: i32) -> i32 {
    %c0_i32 = arith.constant 0 : i32
    %c0_i32_0 = arith.constant 0 : i32
    return %c0_i32 : i32
  }
  func.func @transform_1(%arg0: i32, %arg1: i32) -> (i32, i32, i32, i32) {
    %c0_i32 = arith.constant 0 : i32
    %c0_i32_0 = arith.constant 0 : i32
    %c0_i32_1 = arith.constant 0 : i32
    return %arg0, %c0_i32, %arg1, %c0_i32_0 : i32, i32, i32, i32
  }
  func.func @transform_2(%arg0: i32, %arg1: i32) -> (i32, i32) {
    %c0_i32 = arith.constant 0 : i32
    %c0_i32_0 = arith.constant 0 : i32
    %c0_i32_1 = arith.constant 0 : i32
    return %c0_i32, %c0_i32_0 : i32, i32
  }
  func.func @transform_3(%arg0: i32, %arg1: i32) -> (i32, i32) {
    %c0_i32 = arith.constant 0 : i32
    %c0_i32_0 = arith.constant 0 : i32
    %c0_i32_1 = arith.constant 0 : i32
    return %c0_i32, %c0_i32_0 : i32, i32
  }
  func.func @transform_4(%arg0: i32, %arg1: i32) -> (i32, i32) {
    %c0_i32 = arith.constant 0 : i32
    %c0_i32_0 = arith.constant 0 : i32
    %c0_i32_1 = arith.constant 0 : i32
    return %c0_i32, %c0_i32_0 : i32, i32
  }
  func.func @transform_5(%arg0: i32, %arg1: i32) -> (i32, i32) {
    %c0_i32 = arith.constant 0 : i32
    %c0_i32_0 = arith.constant 0 : i32
    %c0_i32_1 = arith.constant 0 : i32
    return %c0_i32, %c0_i32_0 : i32, i32
  }
  func.func @transform_6(%arg0: i32, %arg1: i32) -> (i32, i32) {
    %c0_i32 = arith.constant 0 : i32
    %c0_i32_0 = arith.constant 0 : i32
    %c0_i32_1 = arith.constant 0 : i32
    return %c0_i32, %c0_i32_0 : i32, i32
  }
  func.func @transform_7(%arg0: i32, %arg1: i32) -> (i32, i32) {
    %c0_i32 = arith.constant 0 : i32
    %c0_i32_0 = arith.constant 0 : i32
    %c0_i32_1 = arith.constant 0 : i32
    return %c0_i32, %c0_i32_0 : i32, i32
  }
  func.func @transform_8(%arg0: i32, %arg1: i32) -> (i32, i32) {
    %c0_i32 = arith.constant 0 : i32
    %c0_i32_0 = arith.constant 0 : i32
    %c0_i32_1 = arith.constant 0 : i32
    return %c0_i32, %c0_i32_0 : i32, i32
  }
  func.func @transform_9(%arg0: i32, %arg1: i32) -> (i32, i32) {
    %c0_i32 = arith.constant 0 : i32
    %c0_i32_0 = arith.constant 0 : i32
    %c0_i32_1 = arith.constant 0 : i32
    return %c0_i32, %c0_i32_0 : i32, i32
  }
  func.func @transform_10(%arg0: i32, %arg1: i32) -> (i32, i32) {
    %c0_i32 = arith.constant 0 : i32
    %c0_i32_0 = arith.constant 0 : i32
    %c0_i32_1 = arith.constant 0 : i32
    return %c0_i32, %c0_i32_0 : i32, i32
  }
  func.func @transform_11(%arg0: i32, %arg1: i32) -> (i32, i32, i32) {
    %c0_i32 = arith.constant 0 : i32
    %c0_i32_0 = arith.constant 0 : i32
    %c0_i32_1 = arith.constant 0 : i32
    return %arg0, %c0_i32, %c0_i32_0 : i32, i32, i32
  }
}

</mosaic_0001>

<bundles_post_ra>
// kernel: ffn_forward.1
= control target key start
LH: loop header
LB: loop body
LE: loop exit
PB: predicated region body
PF: predicated region fallthrough
CT: control target
= control target key end

     0   :  { %s3212_s0 = inlined_call_operand.vmem [shape: f32[5], index: 0, kind: input, shape index: {}]   ;;  %s3213_s1 = inlined_call_operand.vmem [shape: bf16[2,4,32,768], index: 1, kind: input, shape index: {}]   ;;  %s3214_s2 = inlined_call_operand.vmem [shape: bf16[768,128], index: 2, kind: input, shape index: {}]   ;;  %s3215_s3 = inlined_call_operand.vmem [shape: f32[1,128], index: 3, kind: input, shape index: {}]   ;;  %s3216_s4 = inlined_call_operand.vmem [shape: bf16[128,128], index: 4, kind: input, shape index: {}]   ;;  %s3217_s5 = inlined_call_operand.vmem [shape: f32[1,128], index: 5, kind: input, shape index: {}]   ;;  %s3218_s6 = inlined_call_operand.vmem [shape: f32[1,128], index: 6, kind: input, shape index: {}]   ;;  %s3219_s7 = inlined_call_operand.vmem [shape: bf16[256,128], index: 7, kind: input, shape index: {}]   ;;  %s3220_s8 = inlined_call_operand.vmem [shape: f32[1,128], index: 8, kind: input, shape index: {}]   ;;  %s3221_s9 = inlined_call_operand.vmem [shape: bf16[128,128], index: 9, kind: input, shape index: {}]   ;;  %s3222_s10 = inlined_call_operand.vmem [shape: f32[1,128], index: 10, kind: input, shape index: {}]   ;;  %s3223_s11 = inlined_call_operand.hbm [shape: f32[2,1,128], index: 11, kind: output, shape index: {}]  }
   0x1   :  { %3230 = sst [smem:[#allocation18_spill]] %s3212_s0 }
   0x2   :  { %3231 = sst [smem:[#allocation19_spill]] %s3220_s8 }
   0x3   :  { %3232 = sst [smem:[#allocation20_spill]] %s3221_s9 }
   0x4   :  { %3233 = sst [smem:[#allocation21_spill]] %s3222_s10 }
   0x5   :  { %3234 = sst [smem:[#allocation22_spill]] %s3223_s11 }
   0x6   :  { %16 = vsyncpa [#allocation7], 0 }
   0x7   :  { %17 = vsyncpa [#allocation6], 0 }
   0x8   :  { %19 = vsyncpa [#allocation6 + $0x1], 0  ;;  %s2658_s17 = smov 0   ;;  %s2660_s18 = smov 0  }
   0x9   :  { %s2662_s19 = smov 0   ;;  %s2664_s20 = smov 0  }
   0xa   :  { %s2666_s21 = smov 0   ;;  %s2668_s22 = smov 0  }
   0xb   :  { %s2670_s23 = smov 0   ;;  %s2672_s24 = smov 0  }
   0xc   :  { %s2674_s25 = smov 0   ;;  %s2676_s26 = smov 0  }
   0xd LB: > { %3235 = sst [smem:[#allocation12_spill]] %s2560_s19  ;;  %s1862_s27 = sadd.s32 4294967295, %s2588_s26   ;;  %s2588_s26 = sphi %s2676_s26, %s25_s26   ;;  %s2584_s25 = sphi %s2674_s25, %s3267_s25   ;;  %s2580_s24 = sphi %s2672_s24, %s3266_s24   ;;  %s2576_s23 = sphi %s2670_s23, %s3265_s23   ;;  %s2572_s22 = sphi %s2668_s22, %s3264_s22   ;;  %s2568_s21 = sphi %s2666_s21, %s3263_s21   ;;  %s2564_s20 = sphi %s2664_s20, %s3262_s20   ;;  %s2560_s19 = sphi %s2662_s19, %s3256_s19   ;;  %s2556_s18 = sphi %s2660_s18, %s3261_s18   ;;  %s2552_s17 = sphi %s2658_s17, %s3260_s17  }
   0xe   : > { %3236 = sst [smem:[#allocation13_spill]] %s2576_s23  ;;  %s1863_s28 = sadd.s32 4294967294, %s2588_s26  }
   0xf   : > { %s34_s29 = sadd.s32 1, %s2580_s24  ;;  %s37_s30 = sadd.s32 1, %s2584_s25 }
  0x10   : > { %p35_p0 = scmp.ge.s32.totalorder %s34_s29, 2  ;;  %s67_s12 = sadd.s32 1, %s2568_s21 }
  0x11   : > { %p74_p1 = scmp.ne.s32.totalorder %s2568_s21, %s2564_s20  ;;  %p75_p2 = scmp.eq.s32.totalorder %s2588_s26, 0 }
  0x12   : > { %s3269_s29 = smov (%p35_p0, %s34_s29), 0  ;;  %s3271_s30 = smov (!%p35_p0, %s37_s30), %s2584_s25 }
  0x13   : > { %3237 = sst [smem:[#allocation14_spill]] %s3269_s29  ;;  %s63_s13 = ssub.s32 %s2580_s24, %s3269_s29 }
  0x14   : > { %p2721_p3 = por %p75_p2, %p74_p1  ;;  %p39_p4 = scmp.ge.s32.totalorder %s3271_s30, 2 }
  0x15   : > { %s282_s15 = sadd.s32 1, %s2560_s19  ;;  %p292_p5 = scmp.ne.s32.totalorder %s2560_s19, %s2556_s18 }
  0x16   : > { %p293_p6 = scmp.eq.s32.totalorder %s1862_s27, 3  ;;  %s3273_s30 = smov (%p39_p4, %s3271_s30), 0 }
  0x17   : > { %3239 = sst [smem:[#allocation15_spill]] %s3273_s30  ;;  %p298_p8 = scmp.ne.s32.totalorder %s2556_s18, %s2552_s17 }
  0x18   : > { %p2730_p7 = por %p293_p6, %p292_p5  ;;  %s62_s29 = ssub.s32 %s2584_s25, %s3273_s30 }
  0x19   : > { %p299_p9 = scmp.eq.s32.totalorder %s1863_s28, 3  ;;  %s64_s11 = sor.u32 %s63_s13, %s62_s29 }
  0x1a   : > { %s3240_s16 = scalar_select %p2730_p7, 1, 0 }
  0x1b   : > { %p280_p10 = scmp.eq.s32.totalorder %s62_s29, 0  ;;  %p65_p11 = scmp.eq.s32.totalorder %s64_s11, 0 }
  0x1c   : > { %p2738_p12 = por %p299_p9, %p298_p8  ;;  %p1864_p13 = scmp.ge.s32.totalorder %s2588_s26, 1 }
  0x1d   : > { %s2743_s10 = scalar_select %p280_p10, %s2560_s19, %s282_s15  }
  0x1e   : > { %s3241_s23 = scalar_select %p2738_p12, 1, 0 }
  0x1f   : > { %3242 = sst [smem:[#allocation16_spill]] %s2743_s10  ;;  %p306_p0 = scmp.lt.s32.totalorder %s2588_s26, 5 }
  0x20   : > { %s2746_s8 = scalar_select %p65_p11, %s2568_s21, %s67_s12  }
  0x21   : > { %p2750_p1 = scmp.eq.s32.totalorder %s1862_s27, 0  ;;  %p2754_p2 = pnand %p1864_p13, %p306_p0 }
  0x22   : > { %3243 = sst [smem:[#allocation17_spill]] %s2746_s8  ;;  %s3246_s0 = sld [smem:[#allocation18_spill]] }
  0x23   : > { %p2234_p4 = pneg %p2754_p2 }
  0x25   : > { %p2235_p5 = pnand %p2750_p1, %p2234_p4 }
  0x27   : > { %p2461_p8 = pneg %p2235_p5 }
  0x28   : > { %s319_s13 = sshll.u32 %s3246_s0, 4  ;;  %s320_s13 = int_to_ptr.vmem [resolvable:$true] %s319_s13 }
  0x29   : > { %s2459_s12 = scalar_lea.vmem %s320_s13, 16  ;;  %p2467_p11 = scmp.lt.s32.totalorder %s320_s13, %s320_s13 }
  0x2a   : > { %p2460_p6 = scmp.ne.s32.totalorder %s320_s13, %s2459_s12  ;;  %p2468_p13 = scmp.lt.s32.totalorder %s2459_s12, %s2459_s12 }
  0x2c   : > { %p2462_p9 = pnand %p2461_p8, %p2460_p6  ;;  %p2469_p0 = por %p2468_p13, %p2467_p11 }
  0x2e   : > { %p2463_p10 = pneg %p2462_p9 }
  0x30   : > { %p2470_p12 = pnand %p2469_p0, %p2463_p10 }
  0x32   : > { %2473 = shalt.err (!%p2470_p12)
}
  0x33   : > { %s2590_s27 = smov [#allocation5]   ;;  %p1866_p7 = scmp.ge.s32.totalorder %s2588_s26, 4 }
  0x34   : > { %2237 = dma.vmem_to_smem (!%p2235_p5), %s320_s13, 16, %s2590_s27, [#allocation7]  }
  0x35   : > { %353 = sbr.rel (%p1866_p7) target bundleno = 81 (0x51), region = 56 }
  0x3c   : > { %356 = sbr.rel (!%p2721_p3) target bundleno = 81 (0x51), region = 60  ;;  %s358_s15 = sand.u32 (%p2721_p3), 1, %s2568_s21  }
  0x3d   : > { %s2225_s11 = smul.u32 (%p2721_p3), 12, %s2580_s24 }
  0x3e   : > { %s2224_s29 = smul.u32 (%p2721_p3), 192, %s358_s15 }
  0x3f   : > { %s2226_s0 = smul.u32 (%p2721_p3), 96, %s2584_s25 }
  0x40   : > { %s2779_s14 = scalar_lea.vmem (%p2721_p3), [#allocation8], %s2224_s29 }
  0x41   : > { %s364_s30 = sadd.s32 (%p2721_p3), %s2226_s0, %s2225_s11 }
  0x42   : > { %s1869_s12 = sshll.u32 (%p2721_p3), %s364_s30, 2 }
  0x43   : > { %s2774_s19 = scalar_lea.vmem %s3213_s1, %s1869_s12 }
  0x44   : > { %v379_v0 = vld [vmem:[%s2774_s19] sm:$0xff]  ;;  %v381_v1 = vld [vmem:[%s2774_s19 + $0x8] sm:$0xff]  ;;  %v383_v2 = vld [vmem:[%s2774_s19 + $0x10] sm:$0xff] }
  0x45   : > { %380 = vst [vmem:[%s2779_s14] sm:$0xff] %v379_v0  ;;  %382 = vst [vmem:[%s2779_s14 + $0x8] sm:$0xff] %v381_v1  ;;  %v385_v3 = vld [vmem:[%s2774_s19 + $0x18] sm:$0xff]  ;;  %v387_v4 = vld [vmem:[%s2774_s19 + $0x20] sm:$0xff] }
  0x46   : > { %384 = vst [vmem:[%s2779_s14 + $0x10] sm:$0xff] %v383_v2  ;;  %v389_v5 = vld [vmem:[%s2774_s19 + $0x28] sm:$0xff]  ;;  %386 = vst [vmem:[%s2779_s14 + $0x18] sm:$0xff] %v385_v3  ;;  %v391_v6 = vld [vmem:[%s2774_s19 + $0x60] sm:$0xff] }
  0x47   : > { %388 = vst [vmem:[%s2779_s14 + $0x20] sm:$0xff] %v387_v4  ;;  %390 = vst [vmem:[%s2779_s14 + $0x28] sm:$0xff] %v389_v5  ;;  %v393_v7 = vld [vmem:[%s2774_s19 + $0x68] sm:$0xff]  ;;  %v395_v8 = vld [vmem:[%s2774_s19 + $0x70] sm:$0xff] }
  0x48   : > { %392 = vst [vmem:[%s2779_s14 + $0x30] sm:$0xff] %v391_v6  ;;  %394 = vst [vmem:[%s2779_s14 + $0x38] sm:$0xff] %v393_v7  ;;  %v397_v9 = vld [vmem:[%s2774_s19 + $0x78] sm:$0xff]  ;;  %v399_v10 = vld [vmem:[%s2774_s19 + $0x80] sm:$0xff] }
  0x49   : > { %396 = vst [vmem:[%s2779_s14 + $0x40] sm:$0xff] %v395_v8  ;;  %v401_v11 = vld [vmem:[%s2774_s19 + $0x88] sm:$0xff]  ;;  %398 = vst [vmem:[%s2779_s14 + $0x48] sm:$0xff] %v397_v9  ;;  %v403_v12 = vld [vmem:[%s2774_s19 + $0xc0] sm:$0xff] }
  0x4a   : > { %400 = vst [vmem:[%s2779_s14 + $0x50] sm:$0xff] %v399_v10  ;;  %402 = vst [vmem:[%s2779_s14 + $0x58] sm:$0xff] %v401_v11  ;;  %v405_v13 = vld [vmem:[%s2774_s19 + $0xc8] sm:$0xff]  ;;  %v407_v14 = vld [vmem:[%s2774_s19 + $0xd0] sm:$0xff] }
  0x4b   : > { %404 = vst [vmem:[%s2779_s14 + $0x60] sm:$0xff] %v403_v12  ;;  %406 = vst [vmem:[%s2779_s14 + $0x68] sm:$0xff] %v405_v13  ;;  %v409_v15 = vld [vmem:[%s2774_s19 + $0xd8] sm:$0xff]  ;;  %v411_v16 = vld [vmem:[%s2774_s19 + $0xe0] sm:$0xff] }
  0x4c   : > { %408 = vst [vmem:[%s2779_s14 + $0x70] sm:$0xff] %v407_v14  ;;  %v413_v17 = vld [vmem:[%s2774_s19 + $0xe8] sm:$0xff]  ;;  %410 = vst [vmem:[%s2779_s14 + $0x78] sm:$0xff] %v409_v15  ;;  %v415_v18 = vld [vmem:[%s2774_s19 + $0x120] sm:$0xff] }
  0x4d   : > { %412 = vst [vmem:[%s2779_s14 + $0x80] sm:$0xff] %v411_v16  ;;  %414 = vst [vmem:[%s2779_s14 + $0x88] sm:$0xff] %v413_v17  ;;  %v417_v19 = vld [vmem:[%s2774_s19 + $0x128] sm:$0xff]  ;;  %v419_v20 = vld [vmem:[%s2774_s19 + $0x130] sm:$0xff] }
  0x4e   : > { %416 = vst [vmem:[%s2779_s14 + $0x90] sm:$0xff] %v415_v18  ;;  %418 = vst [vmem:[%s2779_s14 + $0x98] sm:$0xff] %v417_v19  ;;  %v421_v21 = vld [vmem:[%s2774_s19 + $0x138] sm:$0xff]  ;;  %v423_v22 = vld [vmem:[%s2774_s19 + $0x140] sm:$0xff] }
  0x4f   : > { %420 = vst [vmem:[%s2779_s14 + $0xa0] sm:$0xff] %v419_v20  ;;  %v425_v23 = vld [vmem:[%s2774_s19 + $0x148] sm:$0xff]  ;;  %422 = vst [vmem:[%s2779_s14 + $0xa8] sm:$0xff] %v421_v21 }
  0x50   : > { %424 = vst [vmem:[%s2779_s14 + $0xb0] sm:$0xff] %v423_v22  ;;  %426 = vst [vmem:[%s2779_s14 + $0xb8] sm:$0xff] %v425_v23 }
  0x51 PF: > { %435 = sbr.rel (%p2754_p2) target bundleno = 1450 (0x5aa), region = 83 }
  0x58   : > { %2543 = dma.done.wait (%p2750_p1), [#allocation7], 16  }
  0x59   : > { %2545 = vsyncadd (%p2750_p1), [#allocation7], 4294967280  ;;  %s442_s0 = sand.u32 1, %s2564_s20  }
  0x5a   : > { %s2227_s8 = smul.u32 192, %s442_s0 }
  0x5c   : > { %s2833_s10 = scalar_lea.vmem [#allocation8], %s2227_s8 }
  0x5d   : > { %448 = sfence }
  0x5e   : > { %s479_s19 = sand.u32 1, %s2556_s18   ;;  %p1872_p3 = scmp.ne.s32.totalorder %s2572_s22, 0 }
  0x5f   : > { %s2838_s30 = scalar_lea.vmem [#allocation9], %s479_s19  ;;  %vm487_vm0 = vcmask (!%p1872_p3), 0   ;;  %v2591_v24 = vmov (!%p1872_p3), 0.0  }
  0x60   : > { %486 = sbr.rel (%p1872_p3) target bundleno = 103 (0x67), region = 95  ;;  %488 = vst.msk [vmem:[#allocation2] sm:$0x1] (!%p1872_p3), %vm487_vm0, %v2591_v24  ;;  %489 = vst [vmem:[#allocation3] sm:$0x1] (!%p1872_p3), %v2591_v24 }
  0x61   : > { %490 = vst [vmem:[#allocation4] sm:$0x1] (!%p1872_p3), %v2591_v24 }
  0x67 PF: > { %v2332_v25 = vld [vmem:[%s3214_s2 + $0x40] sm:$0xff]   ;;  %v2336_v29 = vld [vmem:[%s3214_s2 + $0x48] sm:$0xff]   ;;  %v2340_v33 = vld [vmem:[%s3214_s2 + $0x50] sm:$0xff]   ;;  %vm2593_vm1 = vmmov 0   ;;  %s1214_s13 = sld [smem:[#allocation5]]  ;;  %s1945_s27 = sld [smem:[#allocation5 + $0x1]] }
  0x68   : > { %v2333_v26 = vld [vmem:[%s3214_s2 + $0xc0] sm:$0xff]   ;;  %1988 = vmatprep.subr.bf16.mxu0 %v2332_v25  ;;  %v2337_v30 = vld [vmem:[%s3214_s2 + $0xc8] sm:$0xff]   ;;  %v2341_v34 = vld [vmem:[%s3214_s2 + $0xd0] sm:$0xff]   ;;  %s1946_s15 = sld [smem:[#allocation5 + $0x2]]  ;;  %s1959_s9 = sld [smem:[#allocation5 + $0x4]]  ;;  %vm1394_vm2 = vcmask 0  }
  0x69   : > { %v2334_v27 = vld [vmem:[%s3214_s2] sm:$0xff]   ;;  %2028 = vmatprep.subr.bf16.mxu1 %v2333_v26  ;;  %v2338_v31 = vld [vmem:[%s3214_s2 + $0x8] sm:$0xff]   ;;  %v2342_v35 = vld [vmem:[%s3214_s2 + $0x10] sm:$0xff]   ;;  %p1960_p7 = scmp.ne.s32.totalorder %s2572_s22, 1 }
  0x6a   : > { %v2335_v28 = vld [vmem:[%s3214_s2 + $0x80] sm:$0xff]   ;;  %1989 = vmatpush3.bf16.msra.mxu0 %v2334_v27  ;;  %v2339_v32 = vld [vmem:[%s3214_s2 + $0x88] sm:$0xff]   ;;  %v2343_v36 = vld [vmem:[%s3214_s2 + $0x90] sm:$0xff]   ;;  %vm2596_vm3 = vmmov (!%p1960_p7), 0   ;;  %s3248_s14 = sld [smem:[#allocation19_spill]] (!%p1960_p7) }
  0x6b   : > { %2029 = vmatpush3.bf16.msra.mxu1 %v2335_v28  ;;  %1990 = vmatprep.subr.bf16.mxu0 %v2336_v29  ;;  %v2344_v37 = vld [vmem:[%s3214_s2 + $0x58] sm:$0xff]   ;;  %v2348_v41 = vld [vmem:[%s3214_s2 + $0x60] sm:$0xff]   ;;  %v2352_v45 = vld [vmem:[%s3214_s2 + $0x68] sm:$0xff]  }
  0x6c   : > { %2030 = vmatprep.subr.bf16.mxu1 %v2337_v30  ;;  %v2345_v38 = vld [vmem:[%s3214_s2 + $0xd8] sm:$0xff]   ;;  %v2349_v42 = vld [vmem:[%s3214_s2 + $0xe0] sm:$0xff]   ;;  %v2353_v46 = vld [vmem:[%s3214_s2 + $0xe8] sm:$0xff]  }
  0x6d   : > { %v2346_v39 = vld [vmem:[%s3214_s2 + $0x18] sm:$0xff]   ;;  %v2350_v43 = vld [vmem:[%s3214_s2 + $0x20] sm:$0xff]   ;;  %v2354_v47 = vld [vmem:[%s3214_s2 + $0x28] sm:$0xff]  }
  0x6e   : > { %1991 = vmatpush3.bf16.msra.mxu0 %v2338_v31  ;;  %v2347_v40 = vld [vmem:[%s3214_s2 + $0x98] sm:$0xff]   ;;  %v2351_v44 = vld [vmem:[%s3214_s2 + $0xa0] sm:$0xff]   ;;  %v2355_v48 = vld [vmem:[%s3214_s2 + $0xa8] sm:$0xff]  }
  0x6f   : > { %2031 = vmatpush3.bf16.msra.mxu1 %v2339_v32  ;;  %1992 = vmatprep.subr.bf16.mxu0 %v2340_v33  ;;  %v2356_v49 = vld [vmem:[%s3214_s2 + $0x70] sm:$0xff]   ;;  %v2360_v53 = vld [vmem:[%s3214_s2 + $0x78] sm:$0xff]   ;;  %v2367_v59 = vld [vmem:[%s2833_s10 + $0x8] ss:$24 sps:$4 sm:$0xff]  }
  0x70   : > { %2032 = vmatprep.subr.bf16.mxu1 %v2341_v34  ;;  %v2357_v50 = vld [vmem:[%s3214_s2 + $0xf0] sm:$0xff]   ;;  %v2361_v54 = vld [vmem:[%s3214_s2 + $0xf8] sm:$0xff]   ;;  %v2370_v61 = vld [vmem:[%s3214_s2 + $0x140] sm:$0xff]   ;;  %v2592_v34 = vmov 0.0  }
  0x71   : > { %v2358_v51 = vld [vmem:[%s3214_s2 + $0x30] sm:$0xff]   ;;  %v2362_v55 = vld [vmem:[%s3214_s2 + $0x38] sm:$0xff]   ;;  %v2371_v62 = vld [vmem:[%s3214_s2 + $0x100] sm:$0xff]  }
  0x72   : > { %1993 = vmatpush3.bf16.msra.mxu0 %v2342_v35  ;;  %v2359_v52 = vld [vmem:[%s3214_s2 + $0xb0] sm:$0xff]   ;;  %v2363_v56 = vld [vmem:[%s3214_s2 + $0xb8] sm:$0xff]   ;;  %v2372_v63 = vld [vmem:[%s3214_s2 + $0x148] sm:$0xff]  }
  0x73   : > { %2033 = vmatpush3.bf16.msra.mxu1 %v2343_v36  ;;  %1994 = vmatprep.subr.bf16.mxu0 %v2344_v37  ;;  %v2364_v57 = vld [vmem:[%s2833_s10] ss:$24 sps:$4 sm:$0xff]   ;;  %v2366_v58 = vld [vmem:[%s2833_s10 + $0x4] ss:$24 sps:$4 sm:$0xff]   ;;  %v2374_v1 = vld [vmem:[%s2833_s10 + $0x34] ss:$24 sps:$4 sm:$0xff]  }
  0x74   : > { %2034 = vmatprep.subr.bf16.mxu1 %v2345_v38  ;;  %v2369_v60 = vld [vmem:[%s2833_s10 + $0xc] ss:$24 sps:$4 sm:$0xff]   ;;  %1051 = vmatprep.mubr.bf16.mxu0 %v2366_v58  ;;  %v2376_v2 = vld [vmem:[%s2833_s10 + $0x3c] ss:$24 sps:$4 sm:$0xff]   ;;  %v2378_v3 = vld [vmem:[%s2833_s10 + $0x30] ss:$24 sps:$4 sm:$0xff]  }
  0x75   : > { %1116 = vmatprep.mubr.bf16.mxu1 %v2369_v60  ;;  %v2373_v0 = vld [vmem:[%s3214_s2 + $0x108] sm:$0xff]   ;;  %v2379_v4 = vld [vmem:[%s2833_s10 + $0x38] ss:$24 sps:$4 sm:$0xff]   ;;  %v2390_v12 = vld [vmem:[%s3214_s2 + $0x160] sm:$0xff]  }
  0x76   : > { %1995 = vmatpush3.bf16.msra.mxu0 %v2346_v39  ;;  %v2380_v5 = vld [vmem:[%s3214_s2 + $0x150] sm:$0xff]   ;;  %v2382_v7 = vld [vmem:[%s3214_s2 + $0x158] sm:$0xff]   ;;  %v2389_v13 = vld [vmem:[%s2833_s10 + $0x68] ss:$24 sps:$4 sm:$0xff]  }
  0x77   : > { %2035 = vmatpush3.bf16.msra.mxu1 %v2347_v40  ;;  %1996 = vmatprep.subr.bf16.mxu0 %v2348_v41  ;;  %v2381_v6 = vld [vmem:[%s3214_s2 + $0x110] sm:$0xff]   ;;  %v2383_v8 = vld [vmem:[%s3214_s2 + $0x118] sm:$0xff]   ;;  %v2391_v14 = vld [vmem:[%s3214_s2 + $0x120] sm:$0xff]  }
  0x78   : > { %2036 = vmatprep.subr.bf16.mxu1 %v2349_v42  ;;  %v2384_v9 = vld [vmem:[%s2833_s10 + $0x64] ss:$24 sps:$4 sm:$0xff]   ;;  %v2388_v11 = vld [vmem:[%s2833_s10 + $0x60] ss:$24 sps:$4 sm:$0xff]   ;;  %v2394_v16 = vld [vmem:[%s2833_s10 + $0x94] ss:$24 sps:$4 sm:$0xff]  }
  0x79   : > { %v2386_v10 = vld [vmem:[%s2833_s10 + $0x6c] ss:$24 sps:$4 sm:$0xff]   ;;  %v2396_v17 = vld [vmem:[%s2833_s10 + $0x9c] ss:$24 sps:$4 sm:$0xff]   ;;  %v2398_v20 = vld [vmem:[%s2833_s10 + $0x90] ss:$24 sps:$4 sm:$0xff]  }
  0x7a   : > { %1997 = vmatpush3.bf16.msra.mxu0 %v2350_v43  ;;  %v2392_v15 = vld [vmem:[%s3214_s2 + $0x168] sm:$0xff]   ;;  %v2400_v19 = vld [vmem:[%s3214_s2 + $0x170] sm:$0xff]   ;;  %v2402_v23 = vld [vmem:[%s3214_s2 + $0x178] sm:$0xff]  }
  0x7b   : > { %2037 = vmatpush3.bf16.msra.mxu1 %v2351_v44  ;;  %1998 = vmatprep.subr.bf16.mxu0 %v2352_v45  ;;  %v2393_v18 = vld [vmem:[%s3214_s2 + $0x128] sm:$0xff]   ;;  %v2399_v21 = vld [vmem:[%s2833_s10 + $0x98] ss:$24 sps:$4 sm:$0xff]   ;;  %v2416_v33 = vld [vmem:[%s3216_s4] sm:$0xff]  }
  0x7c   : > { %2038 = vmatprep.subr.bf16.mxu1 %v2353_v46  ;;  %v2401_v22 = vld [vmem:[%s3214_s2 + $0x130] sm:$0xff]   ;;  %v2403_v25 = vld [vmem:[%s3214_s2 + $0x138] sm:$0xff]   ;;  %v2417_v35 = vld [vmem:[%s3216_s4 + $0x8] sm:$0xff]  }
  0x7d   : > { %v2406_v24 = vld [vmem:[%s2833_s10 + $0x14] ss:$24 sps:$4 sm:$0xff]   ;;  %v2404_v26 = vld [vmem:[%s2833_s10 + $0x10] ss:$24 sps:$4 sm:$0xff]   ;;  %v2407_v27 = vld [vmem:[%s2833_s10 + $0x44] ss:$24 sps:$4 sm:$0xff]  }
  0x7e   : > { %1999 = vmatpush3.bf16.msra.mxu0 %v2354_v47  ;;  %v2409_v28 = vld [vmem:[%s2833_s10 + $0x40] ss:$24 sps:$4 sm:$0xff]   ;;  %v2410_v29 = vld [vmem:[%s2833_s10 + $0x74] ss:$24 sps:$4 sm:$0xff]   ;;  %v2412_v30 = vld [vmem:[%s2833_s10 + $0x70] ss:$24 sps:$4 sm:$0xff]  }
  0x7f   : > { %2039 = vmatpush3.bf16.msra.mxu1 %v2355_v48  ;;  %2000 = vmatprep.subr.bf16.mxu0 %v2356_v49  ;;  %v2413_v31 = vld [vmem:[%s2833_s10 + $0xa4] ss:$24 sps:$4 sm:$0xff]   ;;  %v2415_v32 = vld [vmem:[%s2833_s10 + $0xa0] ss:$24 sps:$4 sm:$0xff]   ;;  %v2418_v36 = vld [vmem:[%s3216_s4 + $0x10] sm:$0xff]   ;;  %s1947_s10 = sld [smem:[#allocation5 + $0x3]] }
  0x80   : > { %2040 = vmatprep.subr.bf16.mxu1 %v2357_v50  ;;  %v2419_v37 = vld [vmem:[%s3216_s4 + $0x18] sm:$0xff]   ;;  %v2420_v38 = vld [vmem:[%s3216_s4 + $0x20] sm:$0xff]   ;;  %v2421_v39 = vld [vmem:[%s3216_s4 + $0x28] sm:$0xff]  }
  0x81   : > { %v2422_v40 = vld [vmem:[%s3216_s4 + $0x30] sm:$0xff]   ;;  %v2423_v41 = vld [vmem:[%s3216_s4 + $0x38] sm:$0xff]  }
  0x82   : > { %2001 = vmatpush3.bf16.msra.mxu0 %v2358_v51 }
  0x83   : > { %2041 = vmatpush3.bf16.msra.mxu1 %v2359_v52  ;;  %2002 = vmatprep.subr.bf16.mxu0 %v2360_v53 }
  0x84   : > { %2042 = vmatprep.subr.bf16.mxu1 %v2361_v54 }
  0x86   : > { %2003 = vmatpush3.bf16.msra.mxu0 %v2362_v55 }
  0x87   : > { %2043 = vmatpush3.bf16.msra.mxu1 %v2363_v56  ;;  %2068 = vmatprep.subr.bf16.mxu0 %v2370_v61 }
  0x88   : > { %2144 = vmatprep.subr.bf16.mxu1 %v2592_v34 }
  0x89   : > { %1052 = vmatmul.mubr.bf16.vlgmr.msra.gmra.mrb[0].mxu0 %v2364_v57 }
  0x8a   : > { %1117 = vmatmul.mubr.bf16.vlgmr.msra.gmra.mrb[0].mxu1 %v2367_v59  ;;  %2069 = vmatpush3.bf16.msra.mxu0 %v2371_v62 }
  0x8b   : > { %2070 = vmatprep.subr.bf16.mxu0 %v2372_v63  ;;  %1059 = vmatprep.mubr.bf16.mxu0 %v2374_v1 }
  0x8c   : > { %1124 = vmatprep.mubr.bf16.mxu1 %v2376_v2  ;;  %2145 = vmatpush3.bf16.msra.mxu1 %v2416_v33 }
  0x8d   : > { %2146 = vmatprep.subr.bf16.mxu1 %v2592_v34 }
  0x8e   : > { %2071 = vmatpush3.bf16.msra.mxu0 %v2373_v0 }
  0x8f   : > { %2072 = vmatprep.subr.bf16.mxu0 %v2380_v5 }
  0x90   : > { %2147 = vmatpush3.bf16.msra.mxu1 %v2417_v35 }
  0x91   : > { %1060 = vmatmul.mubr.bf16.gmra.mrb[4].mxu0 %v2378_v3  ;;  %2148 = vmatprep.subr.bf16.mxu1 %v2592_v34 }
  0x92   : > { %1125 = vmatmul.mubr.bf16.gmra.mrb[4].mxu1 %v2379_v4  ;;  %2073 = vmatpush3.bf16.msra.mxu0 %v2381_v6 }
  0x93   : > { %2074 = vmatprep.subr.bf16.mxu0 %v2382_v7  ;;  %1067 = vmatprep.mubr.bf16.mxu0 %v2384_v9 }
  0x94   : > { %1132 = vmatprep.mubr.bf16.mxu1 %v2386_v10  ;;  %2149 = vmatpush3.bf16.msra.mxu1 %v2418_v36 }
  0x95   : > { %2150 = vmatprep.subr.bf16.mxu1 %v2592_v34 }
  0x96   : > { %2075 = vmatpush3.bf16.msra.mxu0 %v2383_v8 }
  0x97   : > { %2076 = vmatprep.subr.bf16.mxu0 %v2390_v12 }
  0x98   : > { %2151 = vmatpush3.bf16.msra.mxu1 %v2419_v37 }
  0x99   : > { %1068 = vmatmul.mubr.bf16.gmra.mrb[8].mxu0 %v2388_v11  ;;  %2152 = vmatprep.subr.bf16.mxu1 %v2592_v34 }
  0x9a   : > { %1133 = vmatmul.mubr.bf16.gmra.mrb[8].mxu1 %v2389_v13  ;;  %2077 = vmatpush3.bf16.msra.mxu0 %v2391_v14 }
  0x9b   : > { %1075 = vmatprep.mubr.bf16.mxu0 %v2394_v16  ;;  %2078 = vmatprep.subr.bf16.mxu0 %v2392_v15 }
  0x9c   : > { %1140 = vmatprep.mubr.bf16.mxu1 %v2396_v17  ;;  %2153 = vmatpush3.bf16.msra.mxu1 %v2420_v38 }
  0x9d   : > { %2154 = vmatprep.subr.bf16.mxu1 %v2592_v34 }
  0x9e   : > { %2079 = vmatpush3.bf16.msra.mxu0 %v2393_v18 }
  0x9f   : > { %2080 = vmatprep.subr.bf16.mxu0 %v2400_v19 }
  0xa0   : > { %2155 = vmatpush3.bf16.msra.mxu1 %v2421_v39 }
  0xa1   : > { %1076 = vmatmul.mubr.bf16.gmra.mrb[12].mxu0 %v2398_v20  ;;  %2156 = vmatprep.subr.bf16.mxu1 %v2592_v34 }
  0xa2   : > { %1141 = vmatmul.mubr.bf16.gmra.mrb[12].mxu1 %v2399_v21  ;;  %1181 = vmatprep.mubr.bf16.mxu0 %v2406_v24 }
  0xa3   : > { %2081 = vmatpush3.bf16.msra.mxu0 %v2401_v22  ;;  %2160 = vmatprep.mubr.msk.bf16.mxu1 %vm2593_vm1, %v2592_v34 }
  0xa4   : > { %2082 = vmatprep.subr.bf16.mxu0 %v2402_v23  ;;  %2157 = vmatpush3.bf16.msra.mxu1 %v2422_v40 }
  0xa5   : > { %2158 = vmatprep.subr.bf16.mxu1 %v2592_v34 }
  0xa7   : > { %2083 = vmatpush3.bf16.msra.mxu0 %v2403_v25 }
  0xa8   : > { %2159 = vmatpush3.bf16.msra.mxu1 %v2423_v41 }
  0xaa   : > { %1182 = vmatmul.mubr.bf16.vlgmr.msra.gmra.mrb[16].mxu0 %v2404_v26 }
  0xab   : > { %1189 = vmatprep.mubr.bf16.mxu0 %v2407_v27 }
  0xb2   : > { %1190 = vmatmul.mubr.bf16.gmra.mrb[20].mxu0 %v2409_v28 }
  0xb3   : > { %1197 = vmatprep.mubr.bf16.mxu0 %v2410_v29 }
  0xba   : > { %1198 = vmatmul.mubr.bf16.gmra.mrb[24].mxu0 %v2412_v30 }
  0xbb   : > { %1205 = vmatprep.mubr.bf16.mxu0 %v2413_v31 }
  0xc2   : > { %1206 = vmatmul.mubr.bf16.gmra.mrb[28].mxu0 %v2415_v32 }
 0x15c   : > { %v2004_v42 = vpop.f32.mrb[0].mxu0 }
 0x15d   : > { %v2044_v43 = vpop.f32.mrb[0].mxu1  ;;  %v2005_v44 = vpop.f32.mrb[1].mxu0 }
 0x15e   : > { %v2006_v45 = vadd.f32 %v2005_v44, %v2004_v42  ;;  %v2045_v46 = vpop.f32.mrb[1].mxu1  ;;  %v2007_v47 = vpop.f32.mrb[2].mxu0 }
 0x15f   : > { %v2046_v48 = vadd.f32 %v2045_v46, %v2044_v43  ;;  %v2047_v49 = vpop.f32.mrb[2].mxu1  ;;  %v2008_v50 = vpop.f32.mrb[3].mxu0  ;;  %v1215_v46 = vstv %s1214_s13 }
 0x160   : > { %v2009_v51 = vadd.f32 %v2008_v50, %v2007_v47  ;;  %v2048_v52 = vpop.f32.mrb[3].mxu1  ;;  %v1219_v47 = vstv %s1945_s27 }
 0x161   : > { %v1119_v53 = vadd.f32 %v2046_v48, %v2006_v45  ;;  %v2049_v54 = vadd.f32 %v2048_v52, %v2047_v49 }
 0x163   : > { %v1122_v55 = vadd.f32 %v2049_v54, %v2009_v51 }
 0x164   : > { %v2010_v56 = vpop.f32.mrb[4].mxu0 }
 0x165   : > { %v2050_v57 = vpop.f32.mrb[4].mxu1  ;;  %v2011_v58 = vpop.f32.mrb[5].mxu0 }
 0x166   : > { %v2012_v59 = vadd.f32 %v2011_v58, %v2010_v56  ;;  %v2051_v60 = vpop.f32.mrb[5].mxu1  ;;  %v2013_v61 = vpop.f32.mrb[6].mxu0 }
 0x167   : > { %v2052_v62 = vadd.f32 %v2051_v60, %v2050_v57  ;;  %v2053_v63 = vpop.f32.mrb[6].mxu1  ;;  %v2014_v0 = vpop.f32.mrb[7].mxu0 }
 0x168   : > { %v2015_v1 = vadd.f32 %v2014_v0, %v2013_v61  ;;  %v2054_v2 = vpop.f32.mrb[7].mxu1 }
 0x169   : > { %v1127_v3 = vadd.f32 %v2052_v62, %v2012_v59  ;;  %v2055_v4 = vadd.f32 %v2054_v2, %v2053_v63  ;;  %v1225_v62 = vstv %s1946_s15 }
 0x16b   : > { %v1130_v5 = vadd.f32 %v2055_v4, %v2015_v1 }
 0x16c   : > { %v2016_v6 = vpop.f32.mrb[8].mxu0 }
 0x16d   : > { %v2056_v7 = vpop.f32.mrb[8].mxu1  ;;  %v2017_v8 = vpop.f32.mrb[9].mxu0 }
 0x16e   : > { %v2018_v9 = vadd.f32 %v2017_v8, %v2016_v6  ;;  %v2057_v10 = vpop.f32.mrb[9].mxu1  ;;  %v2019_v11 = vpop.f32.mrb[10].mxu0 }
 0x16f   : > { %v2058_v12 = vadd.f32 %v2057_v10, %v2056_v7  ;;  %v2059_v13 = vpop.f32.mrb[10].mxu1  ;;  %v2020_v14 = vpop.f32.mrb[11].mxu0 }
 0x170   : > { %v2021_v15 = vadd.f32 %v2020_v14, %v2019_v11  ;;  %v2060_v16 = vpop.f32.mrb[11].mxu1  ;;  %v1231_v11 = vstv %s1947_s10  ;;  %s3247_s10 = sld [smem:[#allocation20_spill]] (!%p1960_p7) }
 0x171   : > { %v1135_v17 = vadd.f32 %v2058_v12, %v2018_v9  ;;  %v2061_v18 = vadd.f32 %v2060_v16, %v2059_v13 }
 0x173   : > { %v1138_v19 = vadd.f32 %v2061_v18, %v2021_v15 }
 0x174   : > { %v2022_v20 = vpop.f32.mrb[12].mxu0 }
 0x175   : > { %v2062_v21 = vpop.f32.mrb[12].mxu1  ;;  %v2023_v22 = vpop.f32.mrb[13].mxu0 }
 0x176   : > { %v2024_v23 = vadd.f32 %v2023_v22, %v2022_v20  ;;  %v2063_v24 = vpop.f32.mrb[13].mxu1  ;;  %v2025_v25 = vpop.f32.mrb[14].mxu0 }
 0x177   : > { %v2064_v26 = vadd.f32 %v2063_v24, %v2062_v21  ;;  %v2065_v27 = vpop.f32.mrb[14].mxu1  ;;  %v2026_v28 = vpop.f32.mrb[15].mxu0 }
 0x178   : > { %v2027_v29 = vadd.f32 %v2026_v28, %v2025_v25  ;;  %v2066_v30 = vpop.f32.mrb[15].mxu1 }
 0x179   : > { %v1143_v31 = vadd.f32 %v2064_v26, %v2024_v23  ;;  %v2067_v32 = vadd.f32 %v2066_v30, %v2065_v27  ;;  %v1949_v26 = vld [vmem:[%s3217_s5] ss:$0 sm:$0xff] }
 0x17b   : > { %v1146_v33 = vadd.f32 %v2067_v32, %v2027_v29 }
 0x17d   : > { %v2084_v34 = vpop.f32.mrb[16].mxu0 }
 0x17e   : > { %v2085_v35 = vpop.f32.mrb[17].mxu0 }
 0x17f   : > { %v2086_v36 = vadd.f32 %v2085_v35, %v2084_v34  ;;  %v2087_v37 = vpop.f32.mrb[18].mxu0 }
 0x180   : > { %v2088_v38 = vpop.f32.mrb[19].mxu0 }
 0x181   : > { %v1184_v39 = vadd.f32 %v2086_v36, %v1119_v53  ;;  %v2089_v40 = vadd.f32 %v2088_v38, %v2087_v37  ;;  %v1376_v38 = vstv %s1959_s9  ;;  %s3249_s9 = sld [smem:[#allocation21_spill]] (!%p1960_p7) }
 0x183   : > { %v1187_v41 = vadd.f32 %v2089_v40, %v1122_v55  ;;  %v1216_v51 = vmul.f32 %v1215_v46, %v1184_v39 }
 0x185   : > { %v2090_v42 = vpop.f32.mrb[20].mxu0  ;;  %v1217_v56 = vmul.f32 %v1215_v46, %v1187_v41 }
 0x186   : > { %v2091_v43 = vpop.f32.mrb[21].mxu0 }
 0x187   : > { %v2092_v44 = vadd.f32 %v2091_v43, %v2090_v42  ;;  %v2093_v45 = vpop.f32.mrb[22].mxu0 }
 0x188   : > { %v2094_v48 = vpop.f32.mrb[23].mxu0 }
 0x189   : > { %v1192_v49 = vadd.f32 %v2092_v44, %v1127_v3  ;;  %v2095_v50 = vadd.f32 %v2094_v48, %v2093_v45 }
 0x18b   : > { %v1220_v52 = vmul.f32 %v1219_v47, %v1192_v49  ;;  %v1195_v54 = vadd.f32 %v2095_v50, %v1130_v5 }
 0x18d   : > { %v1222_v57 = vadd.f32 %v1220_v52, %v1216_v51  ;;  %v1221_v58 = vmul.f32 %v1219_v47, %v1195_v54  ;;  %v2096_v59 = vpop.f32.mrb[24].mxu0 }
 0x18e   : > { %v2097_v53 = vpop.f32.mrb[25].mxu0 }
 0x18f   : > { %v1223_v60 = vadd.f32 %v1221_v58, %v1217_v56  ;;  %v2098_v55 = vadd.f32 %v2097_v53, %v2096_v59  ;;  %v2099_v61 = vpop.f32.mrb[26].mxu0 }
 0x190   : > { %v2100_v63 = vpop.f32.mrb[27].mxu0 }
 0x191   : > { %v1200_v0 = vadd.f32 %v2098_v55, %v1135_v17  ;;  %v2101_v1 = vadd.f32 %v2100_v63, %v2099_v61  ;;  %v1948_v17 = vld [vmem:[%s3215_s3] ss:$0 sm:$0xff] }
 0x193   : > { %v1226_v2 = vmul.f32 %v1225_v62, %v1200_v0  ;;  %v1203_v4 = vadd.f32 %v2101_v1, %v1138_v19 }
 0x195   : > { %v1228_v3 = vadd.f32 %v1226_v2, %v1222_v57  ;;  %v1227_v6 = vmul.f32 %v1225_v62, %v1203_v4  ;;  %v2102_v7 = vpop.f32.mrb[28].mxu0 }
 0x196   : > { %v2103_v8 = vpop.f32.mrb[29].mxu0 }
 0x197   : > { %v1229_v5 = vadd.f32 %v1227_v6, %v1223_v60  ;;  %v2104_v9 = vadd.f32 %v2103_v8, %v2102_v7  ;;  %v2105_v10 = vpop.f32.mrb[30].mxu0 }
 0x198   : > { %v2106_v12 = vpop.f32.mrb[31].mxu0 }
 0x199   : > { %v1208_v13 = vadd.f32 %v2104_v9, %v1143_v31  ;;  %v2107_v14 = vadd.f32 %v2106_v12, %v2105_v10  ;;  %v1958_v31 = vld [vmem:[%s3218_s6] ss:$0 sm:$0xff]  ;;  %v1408_v12 = vld [vmem:[#allocation4] sm:$0x1] }
 0x19b   : > { %v1232_v15 = vmul.f32 %v1231_v11, %v1208_v13  ;;  %v1211_v16 = vadd.f32 %v2107_v14, %v1146_v33 }
 0x19d   : > { %v1234_v18 = vadd.f32 %v1232_v15, %v1228_v3  ;;  %v1233_v20 = vmul.f32 %v1231_v11, %v1211_v16  ;;  %v1385_v3 = vld [vmem:[#allocation2] sm:$0x1] }
 0x19f   : > { %v1243_v19 = vadd.f32 %v1948_v17, %v1234_v18  ;;  %v1235_v21 = vadd.f32 %v1233_v20, %v1229_v5  ;;  %v1398_v5 = vld [vmem:[#allocation3] sm:$0x1]  ;;  %v2595_v18 = vmov (!%p1960_p7), 0.0  }
 0x1a0   : > { %2184 = vmatprep.subr.bf16.mxu1 (!%p1960_p7), %v2595_v18  ;;  %v2433_v20 = vld [vmem:[%s3219_s7] sm:$0xff] (!%p1960_p7)   ;;  %2164 = vmatprep.subr.bf16.mxu0 (!%p1960_p7), %v2595_v18 }
 0x1a1   : > { %v1244_v22 = vadd.f32 %v1948_v17, %v1235_v21  ;;  %v1245_v23 = vmax.f32 %v1243_v19, 0.0  ;;  %v2594_v17 = vmov (!%p1960_p7), 0   ;;  %v2434_v19 = vld [vmem:[%s3219_s7 + $0x40] sm:$0xff] (!%p1960_p7)   ;;  %v2435_v21 = vld [vmem:[%s3219_s7 + $0x8] sm:$0xff] (!%p1960_p7)   ;;  %2180 = vmatprep.mubr.msk.bf16.mxu0 (!%p1960_p7), %vm2596_vm3, %v2595_v18 }
 0x1a2   : > { %2432 = vset.pattern.permute.xlu0 (!%p1960_p7), %v2594_v17  ;;  %2165 = vmatpush3.bf16.msra.mxu0 (!%p1960_p7), %v2434_v19 }
 0x1a3   : > { %v1246_v24 = vmax.f32 %v1244_v22, 0.0  ;;  %v2436_v22 = vld [vmem:[%s3219_s7 + $0x48] sm:$0xff] (!%p1960_p7)   ;;  %2166 = vmatprep.subr.bf16.mxu0 (!%p1960_p7), %v2595_v18 }
 0x1a5   : > { %v1247_v25 = vpack.c.bf16 %v1246_v24, %v1245_v23  ;;  %v2437_v23 = vld [vmem:[%s3219_s7 + $0x10] sm:$0xff] (!%p1960_p7)  }
 0x1a6   : > { %2167 = vmatpush3.bf16.msra.mxu0 (!%p1960_p7), %v2436_v22  ;;  %v2438_v24 = vld [vmem:[%s3219_s7 + $0x50] sm:$0xff] (!%p1960_p7)  }
 0x1a7   : > { %2161 = vmatmul.mubr.bf16.vlgmr.msra.gmra.mrb[16].mxu1 %v1247_v25  ;;  %2168 = vmatprep.subr.bf16.mxu0 (!%p1960_p7), %v2595_v18 }
 0x1a8   : > { %2185 = vmatpush3.bf16.msra.mxu1 (!%p1960_p7), %v2433_v20  ;;  %2200 = vmatprep.mubr.msk.bf16.mxu1 (!%p1960_p7), %vm2596_vm3, %v2595_v18 }
 0x1a9   : > { %2186 = vmatprep.subr.bf16.mxu1 (!%p1960_p7), %v2595_v18 }
 0x1aa   : > { %2169 = vmatpush3.bf16.msra.mxu0 (!%p1960_p7), %v2438_v24 }
 0x1ab   : > { %2170 = vmatprep.subr.bf16.mxu0 (!%p1960_p7), %v2595_v18 }
 0x1ac   : > { %2187 = vmatpush3.bf16.msra.mxu1 (!%p1960_p7), %v2435_v21 }
 0x1ad   : > { %2188 = vmatprep.subr.bf16.mxu1 (!%p1960_p7), %v2595_v18 }
 0x1b0   : > { %2189 = vmatpush3.bf16.msra.mxu1 (!%p1960_p7), %v2437_v23 }
 0x1b1   : > { %2190 = vmatprep.subr.bf16.mxu1 (!%p1960_p7), %v2595_v18 }
 0x27a   : > { %v1353_v27 = vpop.f32.mrb[16].mxu1 }
 0x27b   : > { %v1354_v28 = vadd.f32 %v1949_v26, %v1353_v27  ;;  %v2162_v29 = vpop.f32.mrb[17].mxu1  ;;  %v2440_v27 = vld [vmem:[%s3219_s7 + $0x58] sm:$0xff] (!%p1960_p7)  }
 0x27c   : > { %v1356_v30 = vpop.f32.mrb[18].mxu1  ;;  %v2442_v29 = vld [vmem:[%s3219_s7 + $0x60] sm:$0xff] (!%p1960_p7)   ;;  %2171 = vmatpush3.bf16.msra.mxu0 (!%p1960_p7), %v2440_v27 }
 0x27d   : > { %v1360_v32 = vmax.f32 %v1354_v28, 0.0  ;;  %v1357_v33 = vadd.f32 %v1949_v26, %v1356_v30  ;;  %v2163_v34 = vpop.f32.mrb[19].mxu1  ;;  %v2439_v26 = vld [vmem:[%s3219_s7 + $0x18] sm:$0xff] (!%p1960_p7)   ;;  %v2441_v28 = vld [vmem:[%s3219_s7 + $0x20] sm:$0xff] (!%p1960_p7)   ;;  %2172 = vmatprep.subr.bf16.mxu0 (!%p1960_p7), %v2595_v18  ;;  %v2443_v30 = vld [vmem:[%s3219_s7 + $0x28] sm:$0xff] (!%p1960_p7)  }
 0x27e   : > { %2191 = vmatpush3.bf16.msra.mxu1 (!%p1960_p7), %v2439_v26  ;;  %v2447_v34 = vld [vmem:[%s3219_s7 + $0x38] sm:$0xff] (!%p1960_p7)  }
 0x27f   : > { %v1361_v35 = vmax.f32 %v1357_v33, 0.0  ;;  %v1369_v36 = vmul.f32 %v1958_v31, %v1360_v32  ;;  %2192 = vmatprep.subr.bf16.mxu1 (!%p1960_p7), %v2595_v18  ;;  %v2446_v33 = vld [vmem:[%s3219_s7 + $0x70] sm:$0xff] (!%p1960_p7)  }
 0x280   : > { %2173 = vmatpush3.bf16.msra.mxu0 (!%p1960_p7), %v2442_v29 }
 0x281   : > { %1371 = vadd.xlane.f32.xlu0 %v1369_v36  ;;  %v1370_v37 = vmul.f32 %v1958_v31, %v1361_v35  ;;  %v2444_v31 = vld [vmem:[%s3219_s7 + $0x68] sm:$0xff] (!%p1960_p7)   ;;  %2174 = vmatprep.subr.bf16.mxu0 (!%p1960_p7), %v2595_v18  ;;  %v1432_v36 = vlaneseq (!%p1960_p7) }
 0x282   : > { %2193 = vmatpush3.bf16.msra.mxu1 (!%p1960_p7), %v2441_v28 }
 0x283   : > { %2194 = vmatprep.subr.bf16.mxu1 (!%p1960_p7), %v2595_v18 }
 0x284   : > { %2175 = vmatpush3.bf16.msra.mxu0 (!%p1960_p7), %v2444_v31 }
 0x285   : > { %1373 = vadd.xlane.f32.xlu0 %v1370_v37  ;;  %2176 = vmatprep.subr.bf16.mxu0 (!%p1960_p7), %v2595_v18  ;;  %v1433_v37 = vshrl.u32 (!%p1960_p7), %v1432_v36, 7 }
 0x286   : > { %2195 = vmatpush3.bf16.msra.mxu1 (!%p1960_p7), %v2443_v30 }
 0x287   : > { %2196 = vmatprep.subr.bf16.mxu1 (!%p1960_p7), %v2595_v18 }
 0x288   : > { %2177 = vmatpush3.bf16.msra.mxu0 (!%p1960_p7), %v2446_v33 }
 0x289   : > { %2178 = vmatprep.subr.bf16.mxu0 (!%p1960_p7), %v2595_v18 }
 0x30e   : > { %v1372_v39 = vpop.xlane.xlu0 %1371 }
 0x30f   : > { %v1377_v40 = vadd.f32 %v1376_v38, %v1372_v39 }
 0x311   : > { %2424 = vtanh.f32 %v1377_v40 }
 0x312   : > { %v1374_v41 = vpop.xlane.xlu0 %1373 }
 0x313   : > { %v1378_v42 = vadd.f32 %v1376_v38, %v1374_v41  ;;  %v1434_v38 = vsub.s32 (!%p1960_p7), 0, %v1433_v37 }
 0x315   : > { %2426 = vtanh.f32 %v1378_v42 }
 0x31b   : > { %v2425_v43 = vpop.eup %2424 }
 0x31c   : > { %v1381_v44 = vmul.f32 1.442695, %v2425_v43 }
 0x31e   : > { %2428 = vpow2.f32 %v1381_v44 }
 0x31f   : > { %v2427_v45 = vpop.eup %2426 }
 0x320   : > { %v1383_v46 = vmul.f32 1.442695, %v2427_v45 }
 0x322   : > { %2430 = vpow2.f32 %v1383_v46 }
 0x328   : > { %v2429_v47 = vpop.eup %2428 }
 0x329   : > { %v1396_v48 = vmul.f32 %v2429_v47, %v1360_v32 }
 0x32b   : > { %v1409_v52 = vmul.f32 %v1396_v48, %v1360_v32  ;;  %v2445_v32 = vld [vmem:[%s3219_s7 + $0x30] sm:$0xff] (!%p1960_p7)  }
 0x32c   : > { %v2431_v49 = vpop.eup %2430  ;;  %2197 = vmatpush3.bf16.msra.mxu1 (!%p1960_p7), %v2445_v32 }
 0x32d   : > { %v1386_v50 = vadd.f32 %v2431_v49, %v2429_v47  ;;  %v1397_v51 = vmul.f32 %v2431_v49, %v1361_v35  ;;  %2198 = vmatprep.subr.bf16.mxu1 (!%p1960_p7), %v2595_v18  ;;  %v2449_v49 = vld [vmem:[%s3247_s10] sm:$0xff] (!%p1960_p7)  }
 0x32f   : > { %v1387_v54 = vrot.slane %v1386_v50, 4  ;;  %v1399_v56 = vadd.f32 %v1397_v51, %v1396_v48  ;;  %v1410_v57 = vmul.f32 %v1397_v51, %v1361_v35  ;;  %v2448_v35 = vld [vmem:[%s3219_s7 + $0x78] sm:$0xff] (!%p1960_p7)   ;;  %v2450_v51 = vld [vmem:[%s3247_s10 + $0x8] sm:$0xff] (!%p1960_p7)  }
 0x330   : > { %2199 = vmatpush3.bf16.msra.mxu1 (!%p1960_p7), %v2447_v34  ;;  %2179 = vmatpush3.bf16.msra.mxu0 (!%p1960_p7), %v2448_v35 }
 0x331   : > { %v1388_v58 = vadd.f32 %v1387_v54, %v1386_v50  ;;  %v1400_v59 = vrot.slane %v1399_v56, 4  ;;  %v1411_v53 = vadd.f32 %v1410_v57, %v1409_v52  ;;  %2204 = vmatprep.subr.bf16.mxu0 (!%p1960_p7), %v2595_v18  ;;  %v2451_v52 = vld [vmem:[%s3247_s10 + $0x10] sm:$0xff] (!%p1960_p7)   ;;  %v2452_v54 = vld [vmem:[%s3247_s10 + $0x18] sm:$0xff] (!%p1960_p7)   ;;  %v2454_v57 = vld [vmem:[%s3247_s10 + $0x28] sm:$0xff] (!%p1960_p7)  }
 0x333   : > { %v1389_v60 = vrot.slane %v1388_v58, 2  ;;  %v1401_v55 = vadd.f32 %v1400_v59, %v1399_v56  ;;  %v1412_v61 = vrot.slane %v1411_v53, 4  ;;  %v2453_v56 = vld [vmem:[%s3247_s10 + $0x20] sm:$0xff] (!%p1960_p7)   ;;  %v2456_v59 = vld [vmem:[%s3247_s10 + $0x38] sm:$0xff] (!%p1960_p7)  }
 0x335   : > { %v1390_v62 = vadd.f32 %v1389_v60, %v1388_v58  ;;  %v1402_v63 = vrot.slane %v1401_v55, 2  ;;  %v1413_v0 = vadd.f32 %v1412_v61, %v1411_v53  ;;  %v2455_v58 = vld [vmem:[%s3247_s10 + $0x30] sm:$0xff] (!%p1960_p7)  }
 0x337   : > { %v1391_v1 = vrot.slane %v1390_v62, 1  ;;  %v1403_v2 = vadd.f32 %v1402_v63, %v1401_v55  ;;  %v1414_v4 = vrot.slane %v1413_v0, 2  ;;  %v1652_v63 = vld [vmem:[%s3248_s14] sm:$0x1] (!%p1960_p7) }
 0x339   : > { %v1392_v6 = vadd.f32 %v1391_v1, %v1390_v62  ;;  %v1404_v7 = vrot.slane %v1403_v2, 1  ;;  %v1415_v8 = vadd.f32 %v1414_v4, %v1413_v0 }
 0x33b   : > { %v1393_v9 = vadd.f32 %v1392_v6, %v1385_v3  ;;  %v1405_v10 = vadd.f32 %v1404_v7, %v1403_v2  ;;  %v1416_v11 = vrot.slane %v1415_v8, 1  ;;  %1423 = sbr.rel (%p1960_p7) target bundleno = 1423 (0x58f), region = 99 }
 0x33d   : > { %1395 = vst.msk [vmem:[#allocation2] sm:$0x1] %vm1394_vm2, %v1393_v9  ;;  %v1406_v13 = vadd.f32 %v1405_v10, %v1398_v5  ;;  %v1417_v14 = vadd.f32 %v1416_v11, %v1415_v8  ;;  %v1672_v8 = vld [vmem:[%s3249_s9] sm:$0x1] (!%p1960_p7) }
 0x33f   : > { %1407 = vst [vmem:[#allocation3] sm:$0x1] %v1406_v13  ;;  %v1418_v15 = vadd.f32 %v1417_v14, %v1408_v12 }
 0x341   : > { %1419 = vst [vmem:[#allocation4] sm:$0x1] %v1418_v15 }
 0x344   : > { %v1424_v16 = vld [vmem:[#allocation2] sm:$0x1] }
 0x345   : > { %2457 = vrcp.f32 %v1424_v16 }
 0x346   : > { %v1426_v39 = vld [vmem:[#allocation3] sm:$0x1] }
 0x348   : > { %v1438_v43 = vld [vmem:[#allocation4] sm:$0x1] }
 0x34f   : > { %v2458_v25 = vpop.eup %2457 }
 0x350   : > { %1429 = vperm.xlu0 %2432, %v2458_v25  }
 0x3cf   : > { %v1430_v40 = vpop.permute.xlu0 %1429 }
 0x3d0   : > { %v1435_v41 = vrot.slane %v1430_v40, %v1434_v38 }
 0x3d2   : > { %v1436_v42 = vmul.f32 %v1435_v41, %v1426_v39  ;;  %v1439_v45 = vmul.f32 %v1438_v43, %v1435_v41 }
 0x3d4   : > { %v1437_v44 = vmul.f32 0.03125, %v1436_v42 }
 0x3d6   : > { %v1440_v46 = vmul.f32 %v1437_v44, %v1437_v44  ;;  %v1442_v47 = vpack.c.bf16 %v1437_v44, %v1437_v44 }
 0x3d8   : > { %2201 = vmatmul.mubr.bf16.vlgmr.msra.gmra.mrb[0].mxu1 %v1442_v47  ;;  %v1441_v48 = vsub.f32 %v1439_v45, %v1440_v46 }
 0x3da   : > { %v1459_v50 = vpack.c.bf16 %v1441_v48, %v1441_v48 }
 0x3dc   : > { %2181 = vmatmul.mubr.bf16.vlgmr.msra.gmra.mrb[0].mxu0 %v1459_v50 }
 0x3dd   : > { %2205 = vmatpush3.bf16.msra.mxu0 %v2449_v49  ;;  %2220 = vmatprep.mubr.msk.bf16.mxu0 %vm2596_vm3, %v2595_v18 }
 0x3de   : > { %2206 = vmatprep.subr.bf16.mxu0 %v2595_v18 }
 0x3e1   : > { %2207 = vmatpush3.bf16.msra.mxu0 %v2450_v51 }
 0x3e2   : > { %2208 = vmatprep.subr.bf16.mxu0 %v2595_v18 }
 0x3e5   : > { %2209 = vmatpush3.bf16.msra.mxu0 %v2451_v52 }
 0x3e6   : > { %2210 = vmatprep.subr.bf16.mxu0 %v2595_v18 }
 0x3e9   : > { %2211 = vmatpush3.bf16.msra.mxu0 %v2452_v54 }
 0x3ea   : > { %2212 = vmatprep.subr.bf16.mxu0 %v2595_v18 }
 0x3ed   : > { %2213 = vmatpush3.bf16.msra.mxu0 %v2453_v56 }
 0x3ee   : > { %2214 = vmatprep.subr.bf16.mxu0 %v2595_v18 }
 0x3f1   : > { %2215 = vmatpush3.bf16.msra.mxu0 %v2454_v57 }
 0x3f2   : > { %2216 = vmatprep.subr.bf16.mxu0 %v2595_v18 }
 0x3f5   : > { %2217 = vmatpush3.bf16.msra.mxu0 %v2455_v58 }
 0x3f6   : > { %2218 = vmatprep.subr.bf16.mxu0 %v2595_v18 }
 0x3f9   : > { %2219 = vmatpush3.bf16.msra.mxu0 %v2456_v59 }
 0x4ab   : > { %v1646_v53 = vpop.f32.mrb[0].mxu1 }
 0x4ac   : > { %v2202_v60 = vpop.f32.mrb[1].mxu1 }
 0x4ad   : > { %v1649_v55 = vpop.f32.mrb[2].mxu1 }
 0x4ae   : > { %v2203_v61 = vpop.f32.mrb[3].mxu1 }
 0x4af   : > { %v1558_v62 = vpop.f32.mrb[0].mxu0 }
 0x4b0   : > { %v1647_v0 = vadd.f32 %v1646_v53, %v1558_v62  ;;  %v2182_v1 = vpop.f32.mrb[1].mxu0 }
 0x4b1   : > { %v1561_v2 = vpop.f32.mrb[2].mxu0 }
 0x4b2   : > { %v1653_v4 = vadd.f32 %v1652_v63, %v1647_v0  ;;  %v2183_v3 = vpop.f32.mrb[3].mxu0 }
 0x4b4   : > { %v1654_v6 = vmax.f32 %v1653_v4, 0.0 }
 0x4b6   : > { %v1655_v7 = vpack.c.bf16 %v1654_v6, %v1654_v6 }
 0x4b8   : > { %2221 = vmatmul.mubr.bf16.vlgmr.msra.gmra.mrb[4].mxu0 %v1655_v7 }
 0x58b   : > { %v1755_v5 = vpop.f32.mrb[4].mxu0 }
 0x58c   : > { %v1756_v9 = vadd.f32 %v1755_v5, %v1672_v8  ;;  %v2222_v10 = vpop.f32.mrb[5].mxu0 }
 0x58d   : > { %v1758_v11 = vpop.f32.mrb[6].mxu0 }
 0x58e   : > { %1761 = vst [vmem:[%s2838_s30] sm:$0x1] %v1756_v9  ;;  %v2223_v12 = vpop.f32.mrb[7].mxu0 }
 0x58f PF: > { %s3250_s20 = sld [smem:[#allocation13_spill]]  ;;  %s3251_s22 = sld [smem:[#allocation22_spill]] }
 0x590   : > { %s1775_s29 = sshll.u32 %s2838_s30, 4  ;;  %s1763_s12 = scalar_lea.sflag [#allocation6], %s479_s19  ;;  %s1776_s29 = int_to_ptr.vmem [resolvable:$true] %s1775_s29 }
 0x591   : > { %s2474_s14 = scalar_lea.vmem %s1776_s29, 16  ;;  %p3253_p1 = scmp.ne.s32.totalorder %s3240_s16, 0 }
 0x592   : > { %p2475_p12 = scmp.ne.s32.totalorder %s1776_s29, %s2474_s14  ;;  %s2597_s0 = smov [#allocation9]  }
 0x593   : > { %s2478_s8 = sshll.u32 %s2597_s0, 4  ;;  %s2479_s8 = int_to_ptr.vmem [resolvable:$false] %s2478_s8 }
 0x594   : > { %p2476_p2 = pnand %p2475_p12, %p3253_p1  ;;  %s2480_s9 = scalar_lea.vmem %s2479_s8, 32 }
 0x595   : > { %s1985_s28 = sshll.u32 %s3250_s20, 4  ;;  %s3252_s15 = smov %s3251_s22 }
 0x596   : > { %s3156_s11 = scalar_lea.hbm %s3251_s22, %s1985_s28  ;;  %p2477_p4 = pneg %p2476_p2 }
 0x597   : > { %p2481_p5 = scmp.lt.s32.totalorder %s1776_s29, %s2479_s8  ;;  %p2482_p6 = scmp.lt.s32.totalorder %s2480_s9, %s2474_s14 }
 0x599   : > { %p2483_p8 = por %p2482_p6, %p2481_p5 }
 0x59b   : > { %p2484_p9 = pnand %p2483_p8, %p2477_p4 }
 0x59d   : > { %2487 = shalt.err (!%p2484_p9)
}
 0x59e   : > { %s2488_s19 = scalar_lea.hbm %s3156_s11, 16  ;;  %s2492_s28 = scalar_lea.hbm %s3252_s15, 32 }
 0x59f   : > { %p2489_p10 = scmp.ne.s32.totalorder %s3156_s11, %s2488_s19  ;;  %p2493_p0 = scmp.lt.u32.totalorder %s3156_s11, %s3252_s15 }
 0x5a0   : > { %p2494_p3 = scmp.lt.u32.totalorder %s2492_s28, %s2488_s19  ;;  %p2496_p12 = scmp.lt.u32.totalorder %s2488_s19, %s3156_s11 }
 0x5a1   : > { %p2490_p11 = pnand %p2489_p10, %p3253_p1 }
 0x5a2   : > { %p2495_p7 = por %p2494_p3, %p2493_p0 }
 0x5a3   : > { %p2491_p13 = pneg %p2490_p11 }
 0x5a4   : > { %p2497_p2 = por %p2496_p12, %p2495_p7 }
 0x5a6   : > { %p2498_p4 = pnand %p2497_p2, %p2491_p13 }
 0x5a8   : > { %2501 = shalt.err (!%p2498_p4)
}
 0x5a9   : > { %2232 = dma.vmem_to_hbm [thread:$0]  (%p3253_p1), %s1776_s29, 16, %s3156_s11, %s1763_s12  }
 0x5aa PF: > { %p2244_p5 = scmp.ge.s32.totalorder %s2588_s26, 2  ;;  %s1787_s22 = sand.u32 1, %s2552_s17  }
 0x5ab   : > { %p3254_p6 = scmp.ne.s32.totalorder %s3241_s23, 0  ;;  %s1788_s14 = scalar_lea.sflag [#allocation6], %s1787_s22 }
 0x5ad   : > { %p2239_p8 = pnand %p2244_p5, %p3254_p6 }
 0x5af   : > { %2547 = dma.done.wait (!%p2239_p8), %s1788_s14, 16  }
 0x5b0   : > { %2549 = vsyncadd (!%p2239_p8), %s1788_s14, 4294967280  ;;  %s25_s26 = sadd.s32 1, %s2588_s26   ;;  %s3255_s0 = sld [smem:[#allocation12_spill]] }
 0x5b1   : > { %p22_p9 = scmp.ge.s32.totalorder %s25_s26, 6   ;;  %s3256_s19 = sld [smem:[#allocation16_spill]] }
 0x5b2   : > { %s3257_s16 = sld [smem:[#allocation17_spill]]  ;;  %s3258_s11 = sld [smem:[#allocation14_spill]] }
 0x5b3   : > { %s3259_s29 = sld [smem:[#allocation15_spill]]  ;;  %s3260_s17 = smov %s2556_s18 }
 0x5b4   : > { %s3262_s20 = smov %s2568_s21  ;;  %s3264_s22 = smov %s2580_s24 }
 0x5b5   : > { %s3265_s23 = smov %s2584_s25  ;;  %24 = sbr.rel (!%p22_p9) target bundleno = 13 (0xd), region = 140 }
 0x5b6   : > { %s3261_s18 = smov %s3255_s0 }
 0x5b8   : > { %s3263_s21 = smov %s3257_s16  ;;  %s3266_s24 = smov %s3258_s11 }
 0x5b9   : > { %s3267_s25 = smov %s3259_s29 }
 0x5bc   :  { %1792 = vsyncpa [#allocation6], 1 }
 0x5bd   :  { %1794 = vsyncpa [#allocation6 + $0x1], 1 }
 0x5be   :  { %1795 = vsyncpa [#allocation7], 1 }
 0x5bf   :  { %1797 = vsyncpa [#allocation7 + $0x1], 1 }

</bundles_post_ra>
